<compile_context>
chip_gen: v7x
topology: tpu7x:2x2x1
jax: 0.10.0
libtpu: 0.0.40
codegen_flags: <defaults>
</compile_context>

<pallas_src>
import functools

import jax
import jax.numpy as jnp
from jax.experimental import pallas as pl
from jax.experimental.pallas import tpu as pltpu

# ---------------- model hyper-parameters (small, synthetic) ----------------
VOCAB = 100
MAX_POS = 16
HIDDEN = 32
NUM_HEADS = 4
HEAD_DIM = HIDDEN // NUM_HEADS
INTERMEDIATE = 64
NUM_LAYERS = 2
NUM_CLASSES = 5

H_PAD = 128            # lane-padded hidden width
I_PAD = 128            # lane-padded intermediate width
CLS_PAD = 128          # lane-padded classifier output width
LN_EPS = 1e-12


# ---------------- fused encoder + classifier kernel ----------------
def encoder_kernel(
    emb_ref, bias_ref, eg_ref, eb_ref,
    wqkv_ref, bqkv_ref, wo_ref, bo_ref, ln1g_ref, ln1b_ref,
    w1_ref, b1_ref, w2_ref, b2_ref, ln2g_ref, ln2b_ref,
    clsw_ref, clsb_ref,
    out_ref,
    x_scratch,
    *, batch, seq,
):
    l = pl.program_id(0)
    n_rows = batch * seq

    # lane-valid / per-head masks built from iota (no extra inputs, pure VPU work)
    lane = jax.lax.broadcasted_iota(jnp.int32, (1, H_PAD), 1)
    valid = (lane < HIDDEN).astype(jnp.float32)

    def layer_norm(z, g, b):
        # z has exact zeros in padded lanes; mean/var use the real HIDDEN denominator.
        mean = jnp.sum(z, axis=-1, keepdims=True) * (1.0 / HIDDEN)
        d = (z - mean) * valid
        var = jnp.sum(d * d, axis=-1, keepdims=True) * (1.0 / HIDDEN)
        return d * jax.lax.rsqrt(var + LN_EPS) * g + b

    # ---- first grid step: embedding LayerNorm into the persistent residual scratch ----
    @pl.when(l == 0)
    def _():
        x_scratch[...] = layer_norm(
            emb_ref[...].astype(jnp.float32), eg_ref[...], eb_ref[...])

    x = x_scratch[...]                        # (N, H_PAD) f32 residual
    bias = bias_ref[...]                      # (N, N) additive attn bias (batch block + key pad)

    # ---- one transformer layer (weights streamed for this grid step) ----
    xb = x.astype(jnp.bfloat16)
    qkv = jnp.dot(xb, wqkv_ref[0], preferred_element_type=jnp.float32) + bqkv_ref[0]
    q = qkv[:, :H_PAD]                                       # 128-lane aligned slices
    k = qkv[:, H_PAD:2 * H_PAD].astype(jnp.bfloat16)
    v = qkv[:, 2 * H_PAD:3 * H_PAD]

    ctx = jnp.zeros((n_rows, H_PAD), jnp.float32)
    for h in range(NUM_HEADS):                                # static unroll (4 heads)
        hm = jnp.logical_and(lane >= h * HEAD_DIM,
                             lane < (h + 1) * HEAD_DIM).astype(jnp.float32)
        qm = (q * hm).astype(jnp.bfloat16)                    # full-width mask, no lane slicing
        vm = (v * hm).astype(jnp.bfloat16)
        # scale already folded into Wq; bias already full (N,N)
        s = jax.lax.dot_general(qm, k, (((1,), (1,)), ((), ())),
                                preferred_element_type=jnp.float32) + bias
        m = jnp.max(s, axis=-1, keepdims=True)
        p = jnp.exp(s - m)
        p = p * pl.reciprocal(jnp.sum(p, axis=-1, keepdims=True), approx=True)
        ctx = ctx + jnp.dot(p.astype(jnp.bfloat16), vm,
                            preferred_element_type=jnp.float32)   # accumulate, no concat

    attn = jnp.dot(ctx.astype(jnp.bfloat16), wo_ref[0],
                   preferred_element_type=jnp.float32) + bo_ref[0]
    x = layer_norm(attn + x, ln1g_ref[0], ln1b_ref[0])

    h1 = jnp.dot(x.astype(jnp.bfloat16), w1_ref[0],
                 preferred_element_type=jnp.float32) + b1_ref[0]
    h1 = jax.nn.gelu(h1, approximate=True)                    # f32 VPU/EUP math
    ffn = jnp.dot(h1.astype(jnp.bfloat16), w2_ref[0],
                  preferred_element_type=jnp.float32) + b2_ref[0]
    x = layer_norm(ffn + x, ln2g_ref[0], ln2b_ref[0])

    x_scratch[...] = x

    # ---- last grid step: CLS pooling + dropout(eval identity) + classifier ----
    @pl.when(l == NUM_LAYERS - 1)
    def _():
        r = jax.lax.broadcasted_iota(jnp.int32, (batch, n_rows), 0)
        c = jax.lax.broadcasted_iota(jnp.int32, (batch, n_rows), 1)
        sel = (c == r * seq).astype(jnp.bfloat16)             # picks row b*seq (CLS) per batch
        pooled = jnp.dot(sel, x.astype(jnp.bfloat16),
                         preferred_element_type=jnp.float32)  # (B, H_PAD)
        logits = jnp.dot(pooled.astype(jnp.bfloat16), clsw_ref[...],
                         preferred_element_type=jnp.float32) + clsb_ref[...]
        out_ref[...] = logits                                  # single lane-dense (B,128) store


# ---------------- parameter init (deterministic, zero-lane-padded, stacked per-layer) ----------------
def _pad_to(x, shape):
    pads = [(0, t - s) for s, t in zip(x.shape, shape)]
    return jnp.pad(x, pads)


def init_params(key):
    keys = jax.random.split(key, 12)

    def nrm(k, shape):
        return jax.random.normal(k, shape, jnp.float32) * 0.02

    L = NUM_LAYERS
    scale = 1.0 / (HEAD_DIM ** 0.5)

    # 1/sqrt(head_dim) folded into the Q projection (free at init; removes per-head VPU muls)
    wq = nrm(keys[0], (L, HIDDEN, HIDDEN)) * scale
    wk = nrm(keys[1], (L, HIDDEN, HIDDEN))
    wv = nrm(keys[2], (L, HIDDEN, HIDDEN))
    wqkv = jnp.concatenate(
        [_pad_to(wq, (L, H_PAD, H_PAD)),
         _pad_to(wk, (L, H_PAD, H_PAD)),
         _pad_to(wv, (L, H_PAD, H_PAD))], axis=-1).astype(jnp.bfloat16)

    params = {
        "word_emb": _pad_to(nrm(keys[3], (VOCAB, HIDDEN)), (VOCAB, H_PAD)),
        "pos_emb": _pad_to(nrm(keys[4], (MAX_POS, HIDDEN)), (MAX_POS, H_PAD)),
        "emb_ln_g": _pad_to(jnp.ones((1, HIDDEN), jnp.float32), (1, H_PAD)),
        "emb_ln_b": jnp.zeros((1, H_PAD), jnp.float32),
        "wqkv": wqkv,
        "bqkv": jnp.zeros((L, 1, 3 * H_PAD), jnp.float32),
        "wo": _pad_to(nrm(keys[5], (L, HIDDEN, HIDDEN)), (L, H_PAD, H_PAD)).astype(jnp.bfloat16),
        "bo": jnp.zeros((L, 1, H_PAD), jnp.float32),
        "ln1_g": _pad_to(jnp.ones((L, 1, HIDDEN), jnp.float32), (L, 1, H_PAD)),
        "ln1_b": jnp.zeros((L, 1, H_PAD), jnp.float32),
        "w1": _pad_to(nrm(keys[6], (L, HIDDEN, INTERMEDIATE)), (L, H_PAD, I_PAD)).astype(jnp.bfloat16),
        "b1": jnp.zeros((L, 1, I_PAD), jnp.float32),
        "w2": _pad_to(nrm(keys[7], (L, INTERMEDIATE, HIDDEN)), (L, I_PAD, H_PAD)).astype(jnp.bfloat16),
        "b2": jnp.zeros((L, 1, H_PAD), jnp.float32),
        "ln2_g": _pad_to(jnp.ones((L, 1, HIDDEN), jnp.float32), (L, 1, H_PAD)),
        "ln2_b": jnp.zeros((L, 1, H_PAD), jnp.float32),
        "cls_w": _pad_to(nrm(keys[8], (HIDDEN, NUM_CLASSES)), (H_PAD, CLS_PAD)).astype(jnp.bfloat16),
        "cls_b": jnp.zeros((1, CLS_PAD), jnp.float32),
    }
    return params


# ---------------- forward pass (one pallas_call, layer-streaming grid) ----------------
def multilabel_classifier_forward(params, input_ids, attention_mask):
    B, S = input_ids.shape
    N = B * S

    # embedding gather + positional add is cheap JAX glue (no clean Pallas gather at this size)
    emb = jnp.take(params["word_emb"], input_ids, axis=0) + params["pos_emb"][None, :S, :]
    emb = emb.reshape(N, H_PAD).astype(jnp.bfloat16)          # bf16 activation DMA

    # (N, N) additive attention bias: 0 for same-batch valid keys, -1e9 otherwise
    row_b = jnp.arange(N, dtype=jnp.int32) // S
    key_valid = attention_mask.reshape(N).astype(jnp.int32)
    ok = (row_b[:, None] == row_b[None, :]) & (key_valid[None, :] == 1)
    attn_bias = jnp.where(ok, 0.0, -1e9).astype(jnp.float32)

    kern = functools.partial(encoder_kernel, batch=B, seq=S)

    def resident(nd):
        return lambda l: (0,) * nd

    def per_layer(nd):
        return lambda l: (l,) + (0,) * (nd - 1)

    out = pl.pallas_call(
        kern,
        out_shape=jax.ShapeDtypeStruct((B, CLS_PAD), jnp.float32),
        grid=(NUM_LAYERS,),
        in_specs=[
            pl.BlockSpec((N, H_PAD), resident(2)),                     # emb (resident)
            pl.BlockSpec((N, N), resident(2)),                         # attn bias (resident)
            pl.BlockSpec((1, H_PAD), resident(2)),                     # emb_ln_g
            pl.BlockSpec((1, H_PAD), resident(2)),                     # emb_ln_b
            pl.BlockSpec((1, H_PAD, 3 * H_PAD), per_layer(3)),         # wqkv (streamed per layer)
            pl.BlockSpec((1, 1, 3 * H_PAD), per_layer(3)),             # bqkv
            pl.BlockSpec((1, H_PAD, H_PAD), per_layer(3)),             # wo
            pl.BlockSpec((1, 1, H_PAD), per_layer(3)),                 # bo
            pl.BlockSpec((1, 1, H_PAD), per_layer(3)),                 # ln1_g
            pl.BlockSpec((1, 1, H_PAD), per_layer(3)),                 # ln1_b
            pl.BlockSpec((1, H_PAD, I_PAD), per_layer(3)),             # w1
            pl.BlockSpec((1, 1, I_PAD), per_layer(3)),                 # b1
            pl.BlockSpec((1, I_PAD, H_PAD), per_layer(3)),             # w2
            pl.BlockSpec((1, 1, H_PAD), per_layer(3)),                 # b2
            pl.BlockSpec((1, 1, H_PAD), per_layer(3)),                 # ln2_g
            pl.BlockSpec((1, 1, H_PAD), per_layer(3)),                 # ln2_b
            pl.BlockSpec((H_PAD, CLS_PAD), resident(2)),               # cls_w (lane-padded)
            pl.BlockSpec((1, CLS_PAD), resident(2)),                   # cls_b (lane-padded)
        ],
        out_specs=pl.BlockSpec((B, CLS_PAD), resident(2)),
        scratch_shapes=[pltpu.VMEM((N, H_PAD), jnp.float32)],          # residual across layers
        compiler_params=pltpu.CompilerParams(dimension_semantics=("arbitrary",)),
    )(
        emb, attn_bias, params["emb_ln_g"], params["emb_ln_b"],
        params["wqkv"], params["bqkv"], params["wo"], params["bo"],
        params["ln1_g"], params["ln1_b"], params["w1"], params["b1"],
        params["w2"], params["b2"], params["ln2_g"], params["ln2_b"],
        params["cls_w"], params["cls_b"],
    )
    return out[:, :NUM_CLASSES]


# ---------------- main ----------------
if __name__ == "__main__":
    key = jax.random.PRNGKey(0)
    k_ids, k_params = jax.random.split(key)

    B, S = 2, 8
    input_ids = jax.random.randint(k_ids, (B, S), 0, VOCAB, dtype=jnp.int32)
    # second example has 2 padding tokens at the end
    attention_mask = jnp.array(
        [[1, 1, 1, 1, 1, 1, 1, 1],
         [1, 1, 1, 1, 1, 1, 0, 0]], dtype=jnp.int32
    )

    params = init_params(k_params)

    logits = multilabel_classifier_forward(params, input_ids, attention_mask)
    logits = jax.block_until_ready(logits)

    assert logits.shape == (B, NUM_CLASSES)
    assert bool(jnp.all(jnp.isfinite(logits)))
    print("KERNEL_OK")
</pallas_src>

<mosaic_0001>
module attributes {stable_mosaic.version = 11 : i64} {
  func.func @encoder_kernel(%arg0: i32, %arg1: memref<16x128xbf16, #tpu.memory_space<vmem>>, %arg2: memref<16x16xf32, #tpu.memory_space<vmem>>, %arg3: memref<1x128xf32, #tpu.memory_space<vmem>>, %arg4: memref<1x128xf32, #tpu.memory_space<vmem>>, %arg5: memref<1x128x384xbf16, #tpu.memory_space<vmem>>, %arg6: memref<1x1x384xf32, #tpu.memory_space<vmem>>, %arg7: memref<1x128x128xbf16, #tpu.memory_space<vmem>>, %arg8: memref<1x1x128xf32, #tpu.memory_space<vmem>>, %arg9: memref<1x1x128xf32, #tpu.memory_space<vmem>>, %arg10: memref<1x1x128xf32, #tpu.memory_space<vmem>>, %arg11: memref<1x128x128xbf16, #tpu.memory_space<vmem>>, %arg12: memref<1x1x128xf32, #tpu.memory_space<vmem>>, %arg13: memref<1x128x128xbf16, #tpu.memory_space<vmem>>, %arg14: memref<1x1x128xf32, #tpu.memory_space<vmem>>, %arg15: memref<1x1x128xf32, #tpu.memory_space<vmem>>, %arg16: memref<1x1x128xf32, #tpu.memory_space<vmem>>, %arg17: memref<128x128xbf16, #tpu.memory_space<vmem>>, %arg18: memref<1x128xf32, #tpu.memory_space<vmem>>, %arg19: memref<2x128xf32, #tpu.memory_space<vmem>>, %arg20: memref<16x128xf32, #tpu.memory_space<vmem>>) attributes {dimension_semantics = [#tpu.dimension_semantics<arbitrary>], iteration_bounds = array<i64: 2>, scalar_prefetch = 0 : i64, scratch_operands = 1 : i64, tpu.core_type = #tpu.core_type<tc>, window_params = [{pipeline_mode = #tpu.pipeline_mode<synchronous>, transform_indices = @transform_0, window_bounds = array<i64: 16, 128>}, {pipeline_mode = #tpu.pipeline_mode<synchronous>, transform_indices = @transform_1, window_bounds = array<i64: 16, 16>}, {pipeline_mode = #tpu.pipeline_mode<synchronous>, transform_indices = @transform_2, window_bounds = array<i64: 1, 128>}, {pipeline_mode = #tpu.pipeline_mode<synchronous>, transform_indices = @transform_3, window_bounds = array<i64: 1, 128>}, {transform_indices = @transform_4, window_bounds = array<i64: 1, 128, 384>}, {transform_indices = @transform_5, window_bounds = array<i64: 1, 1, 384>}, {transform_indices = @transform_6, window_bounds = array<i64: 1, 128, 128>}, {transform_indices = @transform_7, window_bounds = array<i64: 1, 1, 128>}, {transform_indices = @transform_8, window_bounds = array<i64: 1, 1, 128>}, {transform_indices = @transform_9, window_bounds = array<i64: 1, 1, 128>}, {transform_indices = @transform_10, window_bounds = array<i64: 1, 128, 128>}, {transform_indices = @transform_11, window_bounds = array<i64: 1, 1, 128>}, {transform_indices = @transform_12, window_bounds = array<i64: 1, 128, 128>}, {transform_indices = @transform_13, window_bounds = array<i64: 1, 1, 128>}, {transform_indices = @transform_14, window_bounds = array<i64: 1, 1, 128>}, {transform_indices = @transform_15, window_bounds = array<i64: 1, 1, 128>}, {pipeline_mode = #tpu.pipeline_mode<synchronous>, transform_indices = @transform_16, window_bounds = array<i64: 128, 128>}, {pipeline_mode = #tpu.pipeline_mode<synchronous>, transform_indices = @transform_17, window_bounds = array<i64: 1, 128>}, {pipeline_mode = #tpu.pipeline_mode<synchronous>, transform_indices = @transform_18, window_bounds = array<i64: 2, 128>}]} {
    %0 = tpu.iota {dimensions = array<i32: 1>} : vector<1x128xi32>
    %c32_i32 = arith.constant 32 : i32
    %1 = vector.broadcast %c32_i32 : i32 to vector<1x128xi32>
    %2 = arith.cmpi slt, %0, %1 : vector<1x128xi32>
    %3 = arith.extui %2 : vector<1x128xi1> to vector<1x128xi32>
    %4 = arith.sitofp %3 : vector<1x128xi32> to vector<1x128xf32>
    %c0_i32 = arith.constant 0 : i32
    %5 = arith.cmpi eq, %arg0, %c0_i32 : i32
    %6 = arith.extui %5 : i1 to i32
    %c0_i32_0 = arith.constant 0 : i32
    %7 = arith.cmpi ne, %6, %c0_i32_0 : i32
    scf.if %7 {
      %c0_82 = arith.constant 0 : index
      %c0_83 = arith.constant 0 : index
      %230 = vector.load %arg1[%c0_82, %c0_83] : memref<16x128xbf16, #tpu.memory_space<vmem>>, vector<16x128xbf16>
      %231 = arith.extf %230 : vector<16x128xbf16> to vector<16x128xf32>
      %c0_84 = arith.constant 0 : index
      %c0_85 = arith.constant 0 : index
      %232 = vector.load %arg3[%c0_84, %c0_85] : memref<1x128xf32, #tpu.memory_space<vmem>>, vector<1x128xf32>
      %c0_86 = arith.constant 0 : index
      %c0_87 = arith.constant 0 : index
      %233 = vector.load %arg4[%c0_86, %c0_87] : memref<1x128xf32, #tpu.memory_space<vmem>>, vector<1x128xf32>
      %cst_88 = arith.constant dense<0.000000e+00> : vector<16xf32>
      %234 = vector.multi_reduction <add>, %231, %cst_88 [1] : vector<16x128xf32> to vector<16xf32>
      %235 = vector.shape_cast %234 : vector<16xf32> to vector<16x1xf32>
      %cst_89 = arith.constant 3.125000e-02 : f32
      %236 = vector.broadcast %cst_89 : f32 to vector<16x1xf32>
      %237 = arith.mulf %235, %236 : vector<16x1xf32>
      %238 = vector.broadcast %237 : vector<16x1xf32> to vector<16x128xf32>
      %239 = arith.subf %231, %238 : vector<16x128xf32>
      %240 = vector.broadcast %4 : vector<1x128xf32> to vector<16x128xf32>
      %241 = arith.mulf %239, %240 : vector<16x128xf32>
      %242 = arith.mulf %241, %241 : vector<16x128xf32>
      %cst_90 = arith.constant dense<0.000000e+00> : vector<16xf32>
      %243 = vector.multi_reduction <add>, %242, %cst_90 [1] : vector<16x128xf32> to vector<16xf32>
      %244 = vector.shape_cast %243 : vector<16xf32> to vector<16x1xf32>
      %cst_91 = arith.constant 3.125000e-02 : f32
      %245 = vector.broadcast %cst_91 : f32 to vector<16x1xf32>
      %246 = arith.mulf %244, %245 : vector<16x1xf32>
      %cst_92 = arith.constant 9.99999996E-13 : f32
      %247 = vector.broadcast %cst_92 : f32 to vector<16x1xf32>
      %248 = arith.addf %246, %247 : vector<16x1xf32>
      %249 = math.rsqrt %248 : vector<16x1xf32>
      %250 = vector.broadcast %249 : vector<16x1xf32> to vector<16x128xf32>
      %251 = arith.mulf %241, %250 : vector<16x128xf32>
      %252 = vector.broadcast %232 : vector<1x128xf32> to vector<16x128xf32>
      %253 = arith.mulf %251, %252 : vector<16x128xf32>
      %254 = vector.broadcast %233 : vector<1x128xf32> to vector<16x128xf32>
      %255 = arith.addf %253, %254 : vector<16x128xf32>
      %c0_93 = arith.constant 0 : index
      %c0_94 = arith.constant 0 : index
      %256 = vector.load %arg20[%c0_93, %c0_94] : memref<16x128xf32, #tpu.memory_space<vmem>>, vector<16x128xf32>
      tpu.vector_store %arg20[%c0_93, %c0_94], %255 {strides = array<i32>} : memref<16x128xf32, #tpu.memory_space<vmem>>, vector<16x128xf32>,
    } else {
    }
    %c0 = arith.constant 0 : index
    %c0_1 = arith.constant 0 : index
    %8 = vector.load %arg20[%c0, %c0_1] : memref<16x128xf32, #tpu.memory_space<vmem>>, vector<16x128xf32>
    %c0_2 = arith.constant 0 : index
    %c0_3 = arith.constant 0 : index
    %9 = vector.load %arg2[%c0_2, %c0_3] : memref<16x16xf32, #tpu.memory_space<vmem>>, vector<16x16xf32>
    %10 = arith.truncf %8 : vector<16x128xf32> to vector<16x128xbf16>
    %c0_4 = arith.constant 0 : index
    %c0_5 = arith.constant 0 : index
    %c0_6 = arith.constant 0 : index
    %11 = vector.load %arg5[%c0_4, %c0_5, %c0_6] : memref<1x128x384xbf16, #tpu.memory_space<vmem>>, vector<1x128x384xbf16>
    %12 = vector.shape_cast %11 : vector<1x128x384xbf16> to vector<128x384xbf16>
    %cst = arith.constant dense<0.000000e+00> : vector<16x384xf32>
    %13 = tpu.matmul %10, %12, %cst {dimension_numbers = #tpu.dot_dimension_numbers<[1], [0], [0], [1], [0, 0, 1, 1], [], []>} : vector<16x128xbf16>, vector<128x384xbf16>, vector<16x384xf32> -> vector<16x384xf32>
    %c0_7 = arith.constant 0 : index
    %c0_8 = arith.constant 0 : index
    %c0_9 = arith.constant 0 : index
    %14 = vector.load %arg6[%c0_7, %c0_8, %c0_9] : memref<1x1x384xf32, #tpu.memory_space<vmem>>, vector<1x1x384xf32>
    %15 = vector.shape_cast %14 : vector<1x1x384xf32> to vector<1x384xf32>
    %16 = vector.broadcast %15 : vector<1x384xf32> to vector<16x384xf32>
    %17 = arith.addf %13, %16 : vector<16x384xf32>
    %18 = vector.extract_strided_slice %17 {offsets = [0, 0], sizes = [16, 128], strides = [1, 1]} : vector<16x384xf32> to vector<16x128xf32>
    %19 = vector.extract_strided_slice %17 {offsets = [0, 128], sizes = [16, 128], strides = [1, 1]} : vector<16x384xf32> to vector<16x128xf32>
    %20 = arith.truncf %19 : vector<16x128xf32> to vector<16x128xbf16>
    %21 = vector.extract_strided_slice %17 {offsets = [0, 256], sizes = [16, 128], strides = [1, 1]} : vector<16x384xf32> to vector<16x128xf32>
    %cst_10 = arith.constant 0.000000e+00 : f32
    %22 = vector.broadcast %cst_10 : f32 to vector<16x128xf32>
    %c0_i32_11 = arith.constant 0 : i32
    %23 = vector.broadcast %c0_i32_11 : i32 to vector<1x128xi32>
    %24 = arith.cmpi sge, %0, %23 : vector<1x128xi32>
    %c8_i32 = arith.constant 8 : i32
    %25 = vector.broadcast %c8_i32 : i32 to vector<1x128xi32>
    %26 = arith.cmpi slt, %0, %25 : vector<1x128xi32>
    %27 = arith.andi %24, %26 : vector<1x128xi1>
    %28 = arith.extui %27 : vector<1x128xi1> to vector<1x128xi32>
    %29 = arith.sitofp %28 : vector<1x128xi32> to vector<1x128xf32>
    %30 = vector.broadcast %29 : vector<1x128xf32> to vector<16x128xf32>
    %31 = arith.mulf %18, %30 : vector<16x128xf32>
    %32 = arith.truncf %31 : vector<16x128xf32> to vector<16x128xbf16>
    %33 = vector.broadcast %29 : vector<1x128xf32> to vector<16x128xf32>
    %34 = arith.mulf %21, %33 : vector<16x128xf32>
    %35 = arith.truncf %34 : vector<16x128xf32> to vector<16x128xbf16>
    %cst_12 = arith.constant dense<0.000000e+00> : vector<16x16xf32>
    %36 = tpu.matmul %32, %20, %cst_12 {dimension_numbers = #tpu.dot_dimension_numbers<[1], [1], [0], [0], [0, 0, 1, 0], [], []>} : vector<16x128xbf16>, vector<16x128xbf16>, vector<16x16xf32> -> vector<16x16xf32>
    %37 = arith.addf %36, %9 : vector<16x16xf32>
    %cst_13 = arith.constant dense<0xFF800000> : vector<16xf32>
    %38 = vector.multi_reduction <maximumf>, %37, %cst_13 [1] : vector<16x16xf32> to vector<16xf32>
    %39 = vector.shape_cast %38 : vector<16xf32> to vector<16x1xf32>
    %40 = vector.broadcast %39 : vector<16x1xf32> to vector<16x16xf32>
    %41 = arith.subf %37, %40 : vector<16x16xf32>
    %42 = math.exp %41 : vector<16x16xf32>
    %cst_14 = arith.constant dense<0.000000e+00> : vector<16xf32>
    %43 = vector.multi_reduction <add>, %42, %cst_14 [1] : vector<16x16xf32> to vector<16xf32>
    %44 = vector.shape_cast %43 : vector<16xf32> to vector<16x1xf32>
    %45 = tpu.reciprocal %44 {approx = true} : vector<16x1xf32> -> vector<16x1xf32>
    %46 = vector.broadcast %45 : vector<16x1xf32> to vector<16x16xf32>
    %47 = arith.mulf %42, %46 : vector<16x16xf32>
    %48 = arith.truncf %47 : vector<16x16xf32> to vector<16x16xbf16>
    %cst_15 = arith.constant dense<0.000000e+00> : vector<16x128xf32>
    %49 = tpu.matmul %48, %35, %cst_15 {dimension_numbers = #tpu.dot_dimension_numbers<[1], [0], [0], [1], [0, 0, 1, 1], [], []>} : vector<16x16xbf16>, vector<16x128xbf16>, vector<16x128xf32> -> vector<16x128xf32>
    %50 = arith.addf %22, %49 : vector<16x128xf32>
    %c8_i32_16 = arith.constant 8 : i32
    %51 = vector.broadcast %c8_i32_16 : i32 to vector<1x128xi32>
    %52 = arith.cmpi sge, %0, %51 : vector<1x128xi32>
    %c16_i32 = arith.constant 16 : i32
    %53 = vector.broadcast %c16_i32 : i32 to vector<1x128xi32>
    %54 = arith.cmpi slt, %0, %53 : vector<1x128xi32>
    %55 = arith.andi %52, %54 : vector<1x128xi1>
    %56 = arith.extui %55 : vector<1x128xi1> to vector<1x128xi32>
    %57 = arith.sitofp %56 : vector<1x128xi32> to vector<1x128xf32>
    %58 = vector.broadcast %57 : vector<1x128xf32> to vector<16x128xf32>
    %59 = arith.mulf %18, %58 : vector<16x128xf32>
    %60 = arith.truncf %59 : vector<16x128xf32> to vector<16x128xbf16>
    %61 = vector.broadcast %57 : vector<1x128xf32> to vector<16x128xf32>
    %62 = arith.mulf %21, %61 : vector<16x128xf32>
    %63 = arith.truncf %62 : vector<16x128xf32> to vector<16x128xbf16>
    %cst_17 = arith.constant dense<0.000000e+00> : vector<16x16xf32>
    %64 = tpu.matmul %60, %20, %cst_17 {dimension_numbers = #tpu.dot_dimension_numbers<[1], [1], [0], [0], [0, 0, 1, 0], [], []>} : vector<16x128xbf16>, vector<16x128xbf16>, vector<16x16xf32> -> vector<16x16xf32>
    %65 = arith.addf %64, %9 : vector<16x16xf32>
    %cst_18 = arith.constant dense<0xFF800000> : vector<16xf32>
    %66 = vector.multi_reduction <maximumf>, %65, %cst_18 [1] : vector<16x16xf32> to vector<16xf32>
    %67 = vector.shape_cast %66 : vector<16xf32> to vector<16x1xf32>
    %68 = vector.broadcast %67 : vector<16x1xf32> to vector<16x16xf32>
    %69 = arith.subf %65, %68 : vector<16x16xf32>
    %70 = math.exp %69 : vector<16x16xf32>
    %cst_19 = arith.constant dense<0.000000e+00> : vector<16xf32>
    %71 = vector.multi_reduction <add>, %70, %cst_19 [1] : vector<16x16xf32> to vector<16xf32>
    %72 = vector.shape_cast %71 : vector<16xf32> to vector<16x1xf32>
    %73 = tpu.reciprocal %72 {approx = true} : vector<16x1xf32> -> vector<16x1xf32>
    %74 = vector.broadcast %73 : vector<16x1xf32> to vector<16x16xf32>
    %75 = arith.mulf %70, %74 : vector<16x16xf32>
    %76 = arith.truncf %75 : vector<16x16xf32> to vector<16x16xbf16>
    %cst_20 = arith.constant dense<0.000000e+00> : vector<16x128xf32>
    %77 = tpu.matmul %76, %63, %cst_20 {dimension_numbers = #tpu.dot_dimension_numbers<[1], [0], [0], [1], [0, 0, 1, 1], [], []>} : vector<16x16xbf16>, vector<16x128xbf16>, vector<16x128xf32> -> vector<16x128xf32>
    %78 = arith.addf %50, %77 : vector<16x128xf32>
    %c16_i32_21 = arith.constant 16 : i32
    %79 = vector.broadcast %c16_i32_21 : i32 to vector<1x128xi32>
    %80 = arith.cmpi sge, %0, %79 : vector<1x128xi32>
    %c24_i32 = arith.constant 24 : i32
    %81 = vector.broadcast %c24_i32 : i32 to vector<1x128xi32>
    %82 = arith.cmpi slt, %0, %81 : vector<1x128xi32>
    %83 = arith.andi %80, %82 : vector<1x128xi1>
    %84 = arith.extui %83 : vector<1x128xi1> to vector<1x128xi32>
    %85 = arith.sitofp %84 : vector<1x128xi32> to vector<1x128xf32>
    %86 = vector.broadcast %85 : vector<1x128xf32> to vector<16x128xf32>
    %87 = arith.mulf %18, %86 : vector<16x128xf32>
    %88 = arith.truncf %87 : vector<16x128xf32> to vector<16x128xbf16>
    %89 = vector.broadcast %85 : vector<1x128xf32> to vector<16x128xf32>
    %90 = arith.mulf %21, %89 : vector<16x128xf32>
    %91 = arith.truncf %90 : vector<16x128xf32> to vector<16x128xbf16>
    %cst_22 = arith.constant dense<0.000000e+00> : vector<16x16xf32>
    %92 = tpu.matmul %88, %20, %cst_22 {dimension_numbers = #tpu.dot_dimension_numbers<[1], [1], [0], [0], [0, 0, 1, 0], [], []>} : vector<16x128xbf16>, vector<16x128xbf16>, vector<16x16xf32> -> vector<16x16xf32>
    %93 = arith.addf %92, %9 : vector<16x16xf32>
    %cst_23 = arith.constant dense<0xFF800000> : vector<16xf32>
    %94 = vector.multi_reduction <maximumf>, %93, %cst_23 [1] : vector<16x16xf32> to vector<16xf32>
    %95 = vector.shape_cast %94 : vector<16xf32> to vector<16x1xf32>
    %96 = vector.broadcast %95 : vector<16x1xf32> to vector<16x16xf32>
    %97 = arith.subf %93, %96 : vector<16x16xf32>
    %98 = math.exp %97 : vector<16x16xf32>
    %cst_24 = arith.constant dense<0.000000e+00> : vector<16xf32>
    %99 = vector.multi_reduction <add>, %98, %cst_24 [1] : vector<16x16xf32> to vector<16xf32>
    %100 = vector.shape_cast %99 : vector<16xf32> to vector<16x1xf32>
    %101 = tpu.reciprocal %100 {approx = true} : vector<16x1xf32> -> vector<16x1xf32>
    %102 = vector.broadcast %101 : vector<16x1xf32> to vector<16x16xf32>
    %103 = arith.mulf %98, %102 : vector<16x16xf32>
    %104 = arith.truncf %103 : vector<16x16xf32> to vector<16x16xbf16>
    %cst_25 = arith.constant dense<0.000000e+00> : vector<16x128xf32>
    %105 = tpu.matmul %104, %91, %cst_25 {dimension_numbers = #tpu.dot_dimension_numbers<[1], [0], [0], [1], [0, 0, 1, 1], [], []>} : vector<16x16xbf16>, vector<16x128xbf16>, vector<16x128xf32> -> vector<16x128xf32>
    %106 = arith.addf %78, %105 : vector<16x128xf32>
    %c24_i32_26 = arith.constant 24 : i32
    %107 = vector.broadcast %c24_i32_26 : i32 to vector<1x128xi32>
    %108 = arith.cmpi sge, %0, %107 : vector<1x128xi32>
    %c32_i32_27 = arith.constant 32 : i32
    %109 = vector.broadcast %c32_i32_27 : i32 to vector<1x128xi32>
    %110 = arith.cmpi slt, %0, %109 : vector<1x128xi32>
    %111 = arith.andi %108, %110 : vector<1x128xi1>
    %112 = arith.extui %111 : vector<1x128xi1> to vector<1x128xi32>
    %113 = arith.sitofp %112 : vector<1x128xi32> to vector<1x128xf32>
    %114 = vector.broadcast %113 : vector<1x128xf32> to vector<16x128xf32>
    %115 = arith.mulf %18, %114 : vector<16x128xf32>
    %116 = arith.truncf %115 : vector<16x128xf32> to vector<16x128xbf16>
    %117 = vector.broadcast %113 : vector<1x128xf32> to vector<16x128xf32>
    %118 = arith.mulf %21, %117 : vector<16x128xf32>
    %119 = arith.truncf %118 : vector<16x128xf32> to vector<16x128xbf16>
    %cst_28 = arith.constant dense<0.000000e+00> : vector<16x16xf32>
    %120 = tpu.matmul %116, %20, %cst_28 {dimension_numbers = #tpu.dot_dimension_numbers<[1], [1], [0], [0], [0, 0, 1, 0], [], []>} : vector<16x128xbf16>, vector<16x128xbf16>, vector<16x16xf32> -> vector<16x16xf32>
    %121 = arith.addf %120, %9 : vector<16x16xf32>
    %cst_29 = arith.constant dense<0xFF800000> : vector<16xf32>
    %122 = vector.multi_reduction <maximumf>, %121, %cst_29 [1] : vector<16x16xf32> to vector<16xf32>
    %123 = vector.shape_cast %122 : vector<16xf32> to vector<16x1xf32>
    %124 = vector.broadcast %123 : vector<16x1xf32> to vector<16x16xf32>
    %125 = arith.subf %121, %124 : vector<16x16xf32>
    %126 = math.exp %125 : vector<16x16xf32>
    %cst_30 = arith.constant dense<0.000000e+00> : vector<16xf32>
    %127 = vector.multi_reduction <add>, %126, %cst_30 [1] : vector<16x16xf32> to vector<16xf32>
    %128 = vector.shape_cast %127 : vector<16xf32> to vector<16x1xf32>
    %129 = tpu.reciprocal %128 {approx = true} : vector<16x1xf32> -> vector<16x1xf32>
    %130 = vector.broadcast %129 : vector<16x1xf32> to vector<16x16xf32>
    %131 = arith.mulf %126, %130 : vector<16x16xf32>
    %132 = arith.truncf %131 : vector<16x16xf32> to vector<16x16xbf16>
    %cst_31 = arith.constant dense<0.000000e+00> : vector<16x128xf32>
    %133 = tpu.matmul %132, %119, %cst_31 {dimension_numbers = #tpu.dot_dimension_numbers<[1], [0], [0], [1], [0, 0, 1, 1], [], []>} : vector<16x16xbf16>, vector<16x128xbf16>, vector<16x128xf32> -> vector<16x128xf32>
    %134 = arith.addf %106, %133 : vector<16x128xf32>
    %135 = arith.truncf %134 : vector<16x128xf32> to vector<16x128xbf16>
    %c0_32 = arith.constant 0 : index
    %c0_33 = arith.constant 0 : index
    %c0_34 = arith.constant 0 : index
    %136 = vector.load %arg7[%c0_32, %c0_33, %c0_34] : memref<1x128x128xbf16, #tpu.memory_space<vmem>>, vector<1x128x128xbf16>
    %137 = vector.shape_cast %136 : vector<1x128x128xbf16> to vector<128x128xbf16>
    %cst_35 = arith.constant dense<0.000000e+00> : vector<16x128xf32>
    %138 = tpu.matmul %135, %137, %cst_35 {dimension_numbers = #tpu.dot_dimension_numbers<[1], [0], [0], [1], [0, 0, 1, 1], [], []>} : vector<16x128xbf16>, vector<128x128xbf16>, vector<16x128xf32> -> vector<16x128xf32>
    %c0_36 = arith.constant 0 : index
    %c0_37 = arith.constant 0 : index
    %c0_38 = arith.constant 0 : index
    %139 = vector.load %arg8[%c0_36, %c0_37, %c0_38] : memref<1x1x128xf32, #tpu.memory_space<vmem>>, vector<1x1x128xf32>
    %140 = vector.shape_cast %139 : vector<1x1x128xf32> to vector<1x128xf32>
    %141 = vector.broadcast %140 : vector<1x128xf32> to vector<16x128xf32>
    %142 = arith.addf %138, %141 : vector<16x128xf32>
    %143 = arith.addf %142, %8 : vector<16x128xf32>
    %c0_39 = arith.constant 0 : index
    %c0_40 = arith.constant 0 : index
    %c0_41 = arith.constant 0 : index
    %144 = vector.load %arg9[%c0_39, %c0_40, %c0_41] : memref<1x1x128xf32, #tpu.memory_space<vmem>>, vector<1x1x128xf32>
    %145 = vector.shape_cast %144 : vector<1x1x128xf32> to vector<1x128xf32>
    %c0_42 = arith.constant 0 : index
    %c0_43 = arith.constant 0 : index
    %c0_44 = arith.constant 0 : index
    %146 = vector.load %arg10[%c0_42, %c0_43, %c0_44] : memref<1x1x128xf32, #tpu.memory_space<vmem>>, vector<1x1x128xf32>
    %147 = vector.shape_cast %146 : vector<1x1x128xf32> to vector<1x128xf32>
    %cst_45 = arith.constant dense<0.000000e+00> : vector<16xf32>
    %148 = vector.multi_reduction <add>, %143, %cst_45 [1] : vector<16x128xf32> to vector<16xf32>
    %149 = vector.shape_cast %148 : vector<16xf32> to vector<16x1xf32>
    %cst_46 = arith.constant 3.125000e-02 : f32
    %150 = vector.broadcast %cst_46 : f32 to vector<16x1xf32>
    %151 = arith.mulf %149, %150 : vector<16x1xf32>
    %152 = vector.broadcast %151 : vector<16x1xf32> to vector<16x128xf32>
    %153 = arith.subf %143, %152 : vector<16x128xf32>
    %154 = vector.broadcast %4 : vector<1x128xf32> to vector<16x128xf32>
    %155 = arith.mulf %153, %154 : vector<16x128xf32>
    %156 = arith.mulf %155, %155 : vector<16x128xf32>
    %cst_47 = arith.constant dense<0.000000e+00> : vector<16xf32>
    %157 = vector.multi_reduction <add>, %156, %cst_47 [1] : vector<16x128xf32> to vector<16xf32>
    %158 = vector.shape_cast %157 : vector<16xf32> to vector<16x1xf32>
    %cst_48 = arith.constant 3.125000e-02 : f32
    %159 = vector.broadcast %cst_48 : f32 to vector<16x1xf32>
    %160 = arith.mulf %158, %159 : vector<16x1xf32>
    %cst_49 = arith.constant 9.99999996E-13 : f32
    %161 = vector.broadcast %cst_49 : f32 to vector<16x1xf32>
    %162 = arith.addf %160, %161 : vector<16x1xf32>
    %163 = math.rsqrt %162 : vector<16x1xf32>
    %164 = vector.broadcast %163 : vector<16x1xf32> to vector<16x128xf32>
    %165 = arith.mulf %155, %164 : vector<16x128xf32>
    %166 = vector.broadcast %145 : vector<1x128xf32> to vector<16x128xf32>
    %167 = arith.mulf %165, %166 : vector<16x128xf32>
    %168 = vector.broadcast %147 : vector<1x128xf32> to vector<16x128xf32>
    %169 = arith.addf %167, %168 : vector<16x128xf32>
    %170 = arith.truncf %169 : vector<16x128xf32> to vector<16x128xbf16>
    %c0_50 = arith.constant 0 : index
    %c0_51 = arith.constant 0 : index
    %c0_52 = arith.constant 0 : index
    %171 = vector.load %arg11[%c0_50, %c0_51, %c0_52] : memref<1x128x128xbf16, #tpu.memory_space<vmem>>, vector<1x128x128xbf16>
    %172 = vector.shape_cast %171 : vector<1x128x128xbf16> to vector<128x128xbf16>
    %cst_53 = arith.constant dense<0.000000e+00> : vector<16x128xf32>
    %173 = tpu.matmul %170, %172, %cst_53 {dimension_numbers = #tpu.dot_dimension_numbers<[1], [0], [0], [1], [0, 0, 1, 1], [], []>} : vector<16x128xbf16>, vector<128x128xbf16>, vector<16x128xf32> -> vector<16x128xf32>
    %c0_54 = arith.constant 0 : index
    %c0_55 = arith.constant 0 : index
    %c0_56 = arith.constant 0 : index
    %174 = vector.load %arg12[%c0_54, %c0_55, %c0_56] : memref<1x1x128xf32, #tpu.memory_space<vmem>>, vector<1x1x128xf32>
    %175 = vector.shape_cast %174 : vector<1x1x128xf32> to vector<1x128xf32>
    %176 = vector.broadcast %175 : vector<1x128xf32> to vector<16x128xf32>
    %177 = arith.addf %173, %176 : vector<16x128xf32>
    %178 = arith.mulf %177, %177 : vector<16x128xf32>
    %179 = arith.mulf %177, %178 : vector<16x128xf32>
    %cst_57 = arith.constant 4.471500e-02 : f32
    %180 = vector.broadcast %cst_57 : f32 to vector<16x128xf32>
    %181 = arith.mulf %180, %179 : vector<16x128xf32>
    %182 = arith.addf %177, %181 : vector<16x128xf32>
    %cst_58 = arith.constant 0.797884583 : f32
    %183 = vector.broadcast %cst_58 : f32 to vector<16x128xf32>
    %184 = arith.mulf %183, %182 : vector<16x128xf32>
    %185 = math.tanh %184 : vector<16x128xf32>
    %cst_59 = arith.constant 1.000000e+00 : f32
    %186 = vector.broadcast %cst_59 : f32 to vector<16x128xf32>
    %187 = arith.addf %186, %185 : vector<16x128xf32>
    %cst_60 = arith.constant 5.000000e-01 : f32
    %188 = vector.broadcast %cst_60 : f32 to vector<16x128xf32>
    %189 = arith.mulf %188, %187 : vector<16x128xf32>
    %190 = arith.mulf %177, %189 : vector<16x128xf32>
    %191 = arith.truncf %190 : vector<16x128xf32> to vector<16x128xbf16>
    %c0_61 = arith.constant 0 : index
    %c0_62 = arith.constant 0 : index
    %c0_63 = arith.constant 0 : index
    %192 = vector.load %arg13[%c0_61, %c0_62, %c0_63] : memref<1x128x128xbf16, #tpu.memory_space<vmem>>, vector<1x128x128xbf16>
    %193 = vector.shape_cast %192 : vector<1x128x128xbf16> to vector<128x128xbf16>
    %cst_64 = arith.constant dense<0.000000e+00> : vector<16x128xf32>
    %194 = tpu.matmul %191, %193, %cst_64 {dimension_numbers = #tpu.dot_dimension_numbers<[1], [0], [0], [1], [0, 0, 1, 1], [], []>} : vector<16x128xbf16>, vector<128x128xbf16>, vector<16x128xf32> -> vector<16x128xf32>
    %c0_65 = arith.constant 0 : index
    %c0_66 = arith.constant 0 : index
    %c0_67 = arith.constant 0 : index
    %195 = vector.load %arg14[%c0_65, %c0_66, %c0_67] : memref<1x1x128xf32, #tpu.memory_space<vmem>>, vector<1x1x128xf32>
    %196 = vector.shape_cast %195 : vector<1x1x128xf32> to vector<1x128xf32>
    %197 = vector.broadcast %196 : vector<1x128xf32> to vector<16x128xf32>
    %198 = arith.addf %194, %197 : vector<16x128xf32>
    %199 = arith.addf %198, %169 : vector<16x128xf32>
    %c0_68 = arith.constant 0 : index
    %c0_69 = arith.constant 0 : index
    %c0_70 = arith.constant 0 : index
    %200 = vector.load %arg15[%c0_68, %c0_69, %c0_70] : memref<1x1x128xf32, #tpu.memory_space<vmem>>, vector<1x1x128xf32>
    %201 = vector.shape_cast %200 : vector<1x1x128xf32> to vector<1x128xf32>
    %c0_71 = arith.constant 0 : index
    %c0_72 = arith.constant 0 : index
    %c0_73 = arith.constant 0 : index
    %202 = vector.load %arg16[%c0_71, %c0_72, %c0_73] : memref<1x1x128xf32, #tpu.memory_space<vmem>>, vector<1x1x128xf32>
    %203 = vector.shape_cast %202 : vector<1x1x128xf32> to vector<1x128xf32>
    %cst_74 = arith.constant dense<0.000000e+00> : vector<16xf32>
    %204 = vector.multi_reduction <add>, %199, %cst_74 [1] : vector<16x128xf32> to vector<16xf32>
    %205 = vector.shape_cast %204 : vector<16xf32> to vector<16x1xf32>
    %cst_75 = arith.constant 3.125000e-02 : f32
    %206 = vector.broadcast %cst_75 : f32 to vector<16x1xf32>
    %207 = arith.mulf %205, %206 : vector<16x1xf32>
    %208 = vector.broadcast %207 : vector<16x1xf32> to vector<16x128xf32>
    %209 = arith.subf %199, %208 : vector<16x128xf32>
    %210 = vector.broadcast %4 : vector<1x128xf32> to vector<16x128xf32>
    %211 = arith.mulf %209, %210 : vector<16x128xf32>
    %212 = arith.mulf %211, %211 : vector<16x128xf32>
    %cst_76 = arith.constant dense<0.000000e+00> : vector<16xf32>
    %213 = vector.multi_reduction <add>, %212, %cst_76 [1] : vector<16x128xf32> to vector<16xf32>
    %214 = vector.shape_cast %213 : vector<16xf32> to vector<16x1xf32>
    %cst_77 = arith.constant 3.125000e-02 : f32
    %215 = vector.broadcast %cst_77 : f32 to vector<16x1xf32>
    %216 = arith.mulf %214, %215 : vector<16x1xf32>
    %cst_78 = arith.constant 9.99999996E-13 : f32
    %217 = vector.broadcast %cst_78 : f32 to vector<16x1xf32>
    %218 = arith.addf %216, %217 : vector<16x1xf32>
    %219 = math.rsqrt %218 : vector<16x1xf32>
    %220 = vector.broadcast %219 : vector<16x1xf32> to vector<16x128xf32>
    %221 = arith.mulf %211, %220 : vector<16x128xf32>
    %222 = vector.broadcast %201 : vector<1x128xf32> to vector<16x128xf32>
    %223 = arith.mulf %221, %222 : vector<16x128xf32>
    %224 = vector.broadcast %203 : vector<1x128xf32> to vector<16x128xf32>
    %225 = arith.addf %223, %224 : vector<16x128xf32>
    %c0_79 = arith.constant 0 : index
    %c0_80 = arith.constant 0 : index
    %226 = vector.load %arg20[%c0_79, %c0_80] : memref<16x128xf32, #tpu.memory_space<vmem>>, vector<16x128xf32>
    tpu.vector_store %arg20[%c0_79, %c0_80], %225 {strides = array<i32>} : memref<16x128xf32, #tpu.memory_space<vmem>>, vector<16x128xf32>,
    %c1_i32 = arith.constant 1 : i32
    %227 = arith.cmpi eq, %arg0, %c1_i32 : i32
    %228 = arith.extui %227 : i1 to i32
    %c0_i32_81 = arith.constant 0 : i32
    %229 = arith.cmpi ne, %228, %c0_i32_81 : i32
    scf.if %229 {
      %230 = tpu.iota {dimensions = array<i32: 0>} : vector<2x16xi32>
      %231 = tpu.iota {dimensions = array<i32: 1>} : vector<2x16xi32>
      %c8_i32_82 = arith.constant 8 : i32
      %232 = vector.broadcast %c8_i32_82 : i32 to vector<2x16xi32>
      %233 = arith.muli %230, %232 : vector<2x16xi32>
      %234 = arith.cmpi eq, %231, %233 : vector<2x16xi32>
      %235 = arith.extui %234 : vector<2x16xi1> to vector<2x16xi32>
      %236 = arith.sitofp %235 : vector<2x16xi32> to vector<2x16xf32>
      %237 = arith.truncf %236 : vector<2x16xf32> to vector<2x16xbf16>
      %238 = arith.truncf %225 : vector<16x128xf32> to vector<16x128xbf16>
      %cst_83 = arith.constant dense<0.000000e+00> : vector<2x128xf32>
      %239 = tpu.matmul %237, %238, %cst_83 {dimension_numbers = #tpu.dot_dimension_numbers<[1], [0], [0], [1], [0, 0, 1, 1], [], []>} : vector<2x16xbf16>, vector<16x128xbf16>, vector<2x128xf32> -> vector<2x128xf32>
      %240 = arith.truncf %239 : vector<2x128xf32> to vector<2x128xbf16>
      %c0_84 = arith.constant 0 : index
      %c0_85 = arith.constant 0 : index
      %241 = vector.load %arg17[%c0_84, %c0_85] : memref<128x128xbf16, #tpu.memory_space<vmem>>, vector<128x128xbf16>
      %cst_86 = arith.constant dense<0.000000e+00> : vector<2x128xf32>
      %242 = tpu.matmul %240, %241, %cst_86 {dimension_numbers = #tpu.dot_dimension_numbers<[1], [0], [0], [1], [0, 0, 1, 1], [], []>} : vector<2x128xbf16>, vector<128x128xbf16>, vector<2x128xf32> -> vector<2x128xf32>
      %c0_87 = arith.constant 0 : index
      %c0_88 = arith.constant 0 : index
      %243 = vector.load %arg18[%c0_87, %c0_88] : memref<1x128xf32, #tpu.memory_space<vmem>>, vector<1x128xf32>
      %244 = vector.broadcast %243 : vector<1x128xf32> to vector<2x128xf32>
      %245 = arith.addf %242, %244 : vector<2x128xf32>
      %c0_89 = arith.constant 0 : index
      %c0_90 = arith.constant 0 : index
      %246 = vector.load %arg19[%c0_89, %c0_90] : memref<2x128xf32, #tpu.memory_space<vmem>>, vector<2x128xf32>
      tpu.vector_store %arg19[%c0_89, %c0_90], %245 {strides = array<i32>} : memref<2x128xf32, #tpu.memory_space<vmem>>, vector<2x128xf32>,
    } else {
    }
    return
  }
  func.func @transform_0(%arg0: i32) -> (i32, i32) {
    %c0_i32 = arith.constant 0 : i32
    %c0_i32_0 = arith.constant 0 : i32
    %c0_i32_1 = arith.constant 0 : i32
    return %c0_i32, %c0_i32_0 : i32, i32
  }
  func.func @transform_1(%arg0: i32) -> (i32, i32) {
    %c0_i32 = arith.constant 0 : i32
    %c0_i32_0 = arith.constant 0 : i32
    %c0_i32_1 = arith.constant 0 : i32
    return %c0_i32, %c0_i32_0 : i32, i32
  }
  func.func @transform_2(%arg0: i32) -> (i32, i32) {
    %c0_i32 = arith.constant 0 : i32
    %c0_i32_0 = arith.constant 0 : i32
    %c0_i32_1 = arith.constant 0 : i32
    return %c0_i32, %c0_i32_0 : i32, i32
  }
  func.func @transform_3(%arg0: i32) -> (i32, i32) {
    %c0_i32 = arith.constant 0 : i32
    %c0_i32_0 = arith.constant 0 : i32
    %c0_i32_1 = arith.constant 0 : i32
    return %c0_i32, %c0_i32_0 : i32, i32
  }
  func.func @transform_4(%arg0: i32) -> (i32, i32, i32) {
    %c0_i32 = arith.constant 0 : i32
    %c0_i32_0 = arith.constant 0 : i32
    %c0_i32_1 = arith.constant 0 : i32
    return %arg0, %c0_i32, %c0_i32_0 : i32, i32, i32
  }
  func.func @transform_5(%arg0: i32) -> (i32, i32, i32) {
    %c0_i32 = arith.constant 0 : i32
    %c0_i32_0 = arith.constant 0 : i32
    %c0_i32_1 = arith.constant 0 : i32
    return %arg0, %c0_i32, %c0_i32_0 : i32, i32, i32
  }
  func.func @transform_6(%arg0: i32) -> (i32, i32, i32) {
    %c0_i32 = arith.constant 0 : i32
    %c0_i32_0 = arith.constant 0 : i32
    %c0_i32_1 = arith.constant 0 : i32
    return %arg0, %c0_i32, %c0_i32_0 : i32, i32, i32
  }
  func.func @transform_7(%arg0: i32) -> (i32, i32, i32) {
    %c0_i32 = arith.constant 0 : i32
    %c0_i32_0 = arith.constant 0 : i32
    %c0_i32_1 = arith.constant 0 : i32
    return %arg0, %c0_i32, %c0_i32_0 : i32, i32, i32
  }
  func.func @transform_8(%arg0: i32) -> (i32, i32, i32) {
    %c0_i32 = arith.constant 0 : i32
    %c0_i32_0 = arith.constant 0 : i32
    %c0_i32_1 = arith.constant 0 : i32
    return %arg0, %c0_i32, %c0_i32_0 : i32, i32, i32
  }
  func.func @transform_9(%arg0: i32) -> (i32, i32, i32) {
    %c0_i32 = arith.constant 0 : i32
    %c0_i32_0 = arith.constant 0 : i32
    %c0_i32_1 = arith.constant 0 : i32
    return %arg0, %c0_i32, %c0_i32_0 : i32, i32, i32
  }
  func.func @transform_10(%arg0: i32) -> (i32, i32, i32) {
    %c0_i32 = arith.constant 0 : i32
    %c0_i32_0 = arith.constant 0 : i32
    %c0_i32_1 = arith.constant 0 : i32
    return %arg0, %c0_i32, %c0_i32_0 : i32, i32, i32
  }
  func.func @transform_11(%arg0: i32) -> (i32, i32, i32) {
    %c0_i32 = arith.constant 0 : i32
    %c0_i32_0 = arith.constant 0 : i32
    %c0_i32_1 = arith.constant 0 : i32
    return %arg0, %c0_i32, %c0_i32_0 : i32, i32, i32
  }
  func.func @transform_12(%arg0: i32) -> (i32, i32, i32) {
    %c0_i32 = arith.constant 0 : i32
    %c0_i32_0 = arith.constant 0 : i32
    %c0_i32_1 = arith.constant 0 : i32
    return %arg0, %c0_i32, %c0_i32_0 : i32, i32, i32
  }
  func.func @transform_13(%arg0: i32) -> (i32, i32, i32) {
    %c0_i32 = arith.constant 0 : i32
    %c0_i32_0 = arith.constant 0 : i32
    %c0_i32_1 = arith.constant 0 : i32
    return %arg0, %c0_i32, %c0_i32_0 : i32, i32, i32
  }
  func.func @transform_14(%arg0: i32) -> (i32, i32, i32) {
    %c0_i32 = arith.constant 0 : i32
    %c0_i32_0 = arith.constant 0 : i32
    %c0_i32_1 = arith.constant 0 : i32
    return %arg0, %c0_i32, %c0_i32_0 : i32, i32, i32
  }
  func.func @transform_15(%arg0: i32) -> (i32, i32, i32) {
    %c0_i32 = arith.constant 0 : i32
    %c0_i32_0 = arith.constant 0 : i32
    %c0_i32_1 = arith.constant 0 : i32
    return %arg0, %c0_i32, %c0_i32_0 : i32, i32, i32
  }
  func.func @transform_16(%arg0: i32) -> (i32, i32) {
    %c0_i32 = arith.constant 0 : i32
    %c0_i32_0 = arith.constant 0 : i32
    %c0_i32_1 = arith.constant 0 : i32
    return %c0_i32, %c0_i32_0 : i32, i32
  }
  func.func @transform_17(%arg0: i32) -> (i32, i32) {
    %c0_i32 = arith.constant 0 : i32
    %c0_i32_0 = arith.constant 0 : i32
    %c0_i32_1 = arith.constant 0 : i32
    return %c0_i32, %c0_i32_0 : i32, i32
  }
  func.func @transform_18(%arg0: i32) -> (i32, i32) {
    %c0_i32 = arith.constant 0 : i32
    %c0_i32_0 = arith.constant 0 : i32
    %c0_i32_1 = arith.constant 0 : i32
    return %c0_i32, %c0_i32_0 : i32, i32
  }
}

</mosaic_0001>

<bundles_post_ra>
// kernel: tpu_custom_call.1
= control target key start
LH: loop header
LB: loop body
LE: loop exit
PB: predicated region body
PF: predicated region fallthrough
CT: control target
= control target key end

     0   :  { %s4272_s0 = inlined_call_operand.hbm [shape: bf16[16,128], index: 0, kind: input, shape index: {}]   ;;  %s4273_s1 = inlined_call_operand.hbm [shape: f32[16,16], index: 1, kind: input, shape index: {}]   ;;  %s4274_s2 = inlined_call_operand.hbm [shape: f32[1,128], index: 2, kind: input, shape index: {}]   ;;  %s4275_s3 = inlined_call_operand.hbm [shape: f32[1,128], index: 3, kind: input, shape index: {}]   ;;  %s4276_s4 = inlined_call_operand.hbm [shape: bf16[2,128,384], index: 4, kind: input, shape index: {}]   ;;  %s4277_s5 = inlined_call_operand.vmem [shape: f32[2,1,384], index: 5, kind: input, shape index: {}]   ;;  %s4278_s6 = inlined_call_operand.hbm [shape: bf16[2,128,128], index: 6, kind: input, shape index: {}]   ;;  %s4279_s7 = inlined_call_operand.vmem [shape: f32[2,1,128], index: 7, kind: input, shape index: {}]   ;;  %s4280_s8 = inlined_call_operand.vmem [shape: f32[2,1,128], index: 8, kind: input, shape index: {}]   ;;  %s4281_s9 = inlined_call_operand.vmem [shape: f32[2,1,128], index: 9, kind: input, shape index: {}]   ;;  %s4282_s10 = inlined_call_operand.hbm [shape: bf16[2,128,128], index: 10, kind: input, shape index: {}]   ;;  %s4283_s11 = inlined_call_operand.vmem [shape: f32[2,1,128], index: 11, kind: input, shape index: {}]   ;;  %s4284_s12 = inlined_call_operand.hbm [shape: bf16[2,128,128], index: 12, kind: input, shape index: {}]   ;;  %s4285_s13 = inlined_call_operand.vmem [shape: f32[2,1,128], index: 13, kind: input, shape index: {}]   ;;  %s4286_s14 = inlined_call_operand.vmem [shape: f32[2,1,128], index: 14, kind: input, shape index: {}]   ;;  %s4287_s15 = inlined_call_operand.vmem [shape: f32[2,1,128], index: 15, kind: input, shape index: {}]   ;;  %s4288_s16 = inlined_call_operand.hbm [shape: bf16[128,128], index: 16, kind: input, shape index: {}]   ;;  %s4289_s17 = inlined_call_operand.vmem [shape: f32[1,128], index: 17, kind: input, shape index: {}]   ;;  %s4290_s18 = inlined_call_operand.hbm [shape: f32[2,128], index: 18, kind: output, shape index: {}]  }
   0x1   :  { %4317 = sst [smem:[#allocation26_spill]] %s4272_s0 }
   0x2   :  { %4318 = sst [smem:[#allocation27_spill]] %s4273_s1 }
   0x3   :  { %4319 = sst [smem:[#allocation28_spill]] %s4274_s2 }
   0x4   :  { %4320 = sst [smem:[#allocation29_spill]] %s4275_s3 }
   0x5   :  { %4321 = sst [smem:[#allocation30_spill]] %s4276_s4 }
   0x6   :  { %4322 = sst [smem:[#allocation31_spill]] %s4277_s5 }
   0x7   :  { %4323 = sst [smem:[#allocation32_spill]] %s4278_s6 }
   0x8   :  { %4324 = sst [smem:[#allocation33_spill]] %s4279_s7 }
   0x9   :  { %4325 = sst [smem:[#allocation34_spill]] %s4280_s8 }
   0xa   :  { %4326 = sst [smem:[#allocation35_spill]] %s4281_s9 }
   0xb   :  { %4327 = sst [smem:[#allocation36_spill]] %s4282_s10 }
   0xc   :  { %4328 = sst [smem:[#allocation37_spill]] %s4283_s11 }
   0xd   :  { %4329 = sst [smem:[#allocation38_spill]] %s4284_s12 }
   0xe   :  { %4330 = sst [smem:[#allocation39_spill]] %s4285_s13 }
   0xf   :  { %4331 = sst [smem:[#allocation40_spill]] %s4286_s14 }
  0x10   :  { %4332 = sst [smem:[#allocation41_spill]] %s4287_s15 }
  0x11   :  { %4333 = sst [smem:[#allocation42_spill]] %s4289_s17 }
  0x12   :  { %4334 = sst [smem:[#allocation43_spill]] %s4290_s18 }
  0x13   :  { %23 = vsyncpa [#allocation4], 0 }
  0x14   :  { %24 = vsyncpa [#allocation7], 0 }
  0x15   :  { %25 = vsyncpa [#allocation10], 0 }
  0x16   :  { %26 = vsyncpa [#allocation5], 0  ;;  %s3576_s27 = smov 0   ;;  %s3578_s28 = smov 0  }
  0x17   :  { %s3580_s29 = smov 0   ;;  %s3582_s30 = smov 0  }
  0x18 LB: > { %s3595_s0 = sadd.s32 4294967295, %s3458_s30   ;;  %p136_p0 = scmp.ne.s32.totalorder %s3450_s28, %s3446_s27  ;;  %s3458_s30 = sphi %s3582_s30, %s4396_s30   ;;  %s3454_s29 = sphi %s3580_s29, %s4400_s29   ;;  %s3450_s28 = sphi %s3578_s28, %s4399_s28   ;;  %s3446_s27 = sphi %s3576_s27, %s4398_s27  }
  0x19   : > { %p4295_p1 = scmp.eq.s32.totalorder %s3595_s0, 0  ;;  %p2534_p2 = scmp.ge.s32.totalorder %s3458_s30, 1 }
  0x1a   : > { %p496_p3 = scmp.lt.s32.totalorder %s3458_s30, 3  ;;  %s3460_s20 = smov [#allocation3]  }
  0x1b   : > { %p3604_p5 = por %p4295_p1, %p136_p0  ;;  %s508_s21 = sshll.u32 %s3460_s20, 4  ;;  %s509_s21 = int_to_ptr.vmem [resolvable:$true] %s508_s21 }
  0x1c   : > { %p3608_p6 = pnand %p2534_p2, %p496_p3  ;;  %s3621_s2 = sadd.s32 1, %s3458_s30  }
  0x1d   : > { %s4335_s19 = scalar_select %p3604_p5, 1, 0 }
  0x1e   : > { %s4337_s1 = scalar_select %p3608_p6, 1, 0 }
  0x1f   : > { %4336 = sst [smem:[#allocation23_spill]] %s4335_s19  ;;  %p2915_p7 = pneg %p3608_p6 }
  0x20   : > { %4339 = sst [smem:[#allocation24_spill]] %s3621_s2  ;;  %s123_s23 = sadd.s32 1, %s3454_s29 }
  0x21   : > { %p3616_p8 = pnand %p2915_p7, %p4295_p1  ;;  %s120_s24 = ssub.s32 %s3458_s30, %s3621_s2 }
  0x22   : > { %s4340_s27 = sld [smem:[#allocation26_spill]] }
  0x23   : > { %s4338_s22 = scalar_select %p3616_p8, 1, 0 }
  0x24   : > { %p3634_p10 = pneg %p3616_p8 }
  0x26   : > { %s4342_s14 = scalar_select %p3634_p10, 1, 0 }
  0x28   : > { %s4341_s18 = smov %s4340_s27  ;;  %s3118_s17 = scalar_lea.hbm %s4340_s27, 128 }
  0x29   : > { %p3119_p9 = scmp.ne.s32.totalorder %s4341_s18, %s3118_s17  ;;  %p3125_p13 = scmp.lt.u32.totalorder %s3118_s17, %s4341_s18 }
  0x2b   : > { %p3121_p11 = pnand %p3634_p10, %p3119_p9 }
  0x2d   : > { %p3122_p12 = pneg %p3121_p11 }
  0x2f   : > { %p3127_p0 = pnand %p3125_p13, %p3122_p12 }
  0x31   : > { %3130 = shalt.err (!%p3127_p0)
}
  0x32   : > { %s3131_s25 = scalar_lea.vmem %s509_s21, 128  ;;  %p3139_p4 = scmp.lt.s32.totalorder %s509_s21, %s509_s21 }
  0x33   : > { %p3132_p2 = scmp.ne.s32.totalorder %s509_s21, %s3131_s25  ;;  %p3140_p1 = scmp.lt.s32.totalorder %s3131_s25, %s3131_s25 }
  0x35   : > { %p3134_p3 = pnand %p3132_p2, %p3634_p10  ;;  %p3141_p5 = por %p3140_p1, %p3139_p4 }
  0x37   : > { %p3135_p7 = pneg %p3134_p3 }
  0x39   : > { %p3142_p6 = pnand %p3141_p5, %p3135_p7 }
  0x3b   : > { %3145 = shalt.err (!%p3142_p6)
}
  0x3c   : > { %s4300_s15 = smov 64   ;;  %s4302_s11 = smov 4  }
  0x3d   : > { %2918 = dma.hbm_to_vmem [thread:$0]  (!%p3616_p8), %s4341_s18, 128, %s509_s21, [#allocation4], %s4300_s15, %s4300_s15, %s4302_s11  }
  0x3e   : > { %p121_p1 = scmp.eq.s32.totalorder %s120_s24, 0  ;;  %p130_p4 = scmp.ne.s32.totalorder %s3454_s29, %s3450_s28 }
  0x3f   : > { %p131_p5 = scmp.eq.s32.totalorder %s3458_s30, 0  ;;  %p2949_p6 = scmp.lt.s32.totalorder %s3458_s30, 2 }
  0x40   : > { %s3658_s26 = scalar_select %p121_p1, %s3454_s29, %s123_s23  }
  0x41   : > { %p132_p9 = por %p131_p5, %p130_p4  ;;  %s573_s27 = sand.u32 1, %s3458_s30  }
  0x42   : > { %4343 = sst [smem:[#allocation25_spill]] %s3658_s26  ;;  %s4308_s20 = sand.u32 1, %s3454_s29  }
  0x43   : > { %s2879_s25 = smul.u32 192, %s4308_s20  ;;  %p3664_p11 = pnand %p2949_p6, %p132_p9 }
  0x44   : > { %s2880_s5 = smul.u32 3072, %s3458_s30  ;;  %s4345_s4 = sld [smem:[#allocation30_spill]] }
  0x45   : > { %s4344_s2 = scalar_select %p3664_p11, 1, 0 }
  0x46   : > { %s577_s23 = scalar_lea.vmem [#allocation11], %s2879_s25  ;;  %s3676_s17 = scalar_lea.sflag [#allocation4], %s573_s27 }
  0x47   : > { %s584_s24 = sshll.u32 %s577_s23, 4  ;;  %p3682_p13 = pneg %p3664_p11  ;;  %s3674_s24 = int_to_ptr.vmem [resolvable:$true] %s584_s24 }
  0x49   : > { %s4346_s11 = scalar_select %p3682_p13, 1, 0 }
  0x4a   : > { %s3672_s21 = scalar_lea.hbm %s4345_s4, %s2880_s5  ;;  %s3151_s25 = scalar_lea.hbm %s4345_s4, 6144 }
  0x4b   : > { %s3146_s15 = scalar_lea.hbm %s3672_s21, 3072  ;;  %p3152_p3 = scmp.lt.u32.totalorder %s3672_s21, %s4345_s4 }
  0x4c   : > { %p3147_p12 = scmp.ne.s32.totalorder %s3672_s21, %s3146_s15  ;;  %p3153_p7 = scmp.lt.u32.totalorder %s3151_s25, %s3146_s15 }
  0x4d   : > { %p3155_p4 = scmp.lt.u32.totalorder %s3146_s15, %s3672_s21 }
  0x4e   : > { %p3149_p0 = pnand %p3682_p13, %p3147_p12  ;;  %p3154_p1 = por %p3153_p7, %p3152_p3 }
  0x50   : > { %p3150_p2 = pneg %p3149_p0  ;;  %p3156_p5 = por %p3155_p4, %p3154_p1 }
  0x52   : > { %p3157_p6 = pnand %p3156_p5, %p3150_p2 }
  0x54   : > { %3160 = shalt.err (!%p3157_p6)
}
  0x55   : > { %s3161_s27 = scalar_lea.vmem %s3674_s24, 3072  ;;  %s3463_s5 = smov [#allocation11]  }
  0x56   : > { %p3162_p9 = scmp.ne.s32.totalorder %s3674_s24, %s3161_s27  ;;  %s3166_s9 = sshll.u32 %s3463_s5, 4  ;;  %s3167_s9 = int_to_ptr.vmem [resolvable:$false] %s3166_s9 }
  0x57   : > { %s3168_s13 = scalar_lea.vmem %s3167_s9, 6144  ;;  %p3169_p8 = scmp.lt.s32.totalorder %s3674_s24, %s3167_s9 }
  0x58   : > { %p3164_p12 = pnand %p3162_p9, %p3682_p13  ;;  %p3170_p10 = scmp.lt.s32.totalorder %s3168_s13, %s3161_s27 }
  0x5a   : > { %p3165_p0 = pneg %p3164_p12  ;;  %p3171_p3 = por %p3170_p10, %p3169_p8 }
  0x5c   : > { %p3172_p7 = pnand %p3171_p3, %p3165_p0 }
  0x5e   : > { %3175 = shalt.err (!%p3172_p7)
}
  0x5f   : > { %s3464_s15 = smov 192   ;;  %s3465_s25 = smov 12  }
  0x60   : > { %2934 = dma.hbm_to_vmem [thread:$0]  (!%p3664_p11), %s3672_s21, 3072, %s3674_s24, %s3676_s17, %s3464_s15, %s3464_s15, %s3465_s25  }
  0x61   : > { %s3466_s23 = smov [#allocation6]   ;;  %s4347_s5 = sand.u32 1, %s3454_s29  }
  0x62   : > { %s521_s20 = sshll.u32 %s3466_s23, 4  ;;  %s3708_s4 = sshll.u32 %s4347_s5, 6  ;;  %s522_s20 = int_to_ptr.vmem [resolvable:$true] %s521_s20 }
  0x63   : > { %s4348_s13 = sld [smem:[#allocation27_spill]]  ;;  %p4349_p10 = scmp.ne.s32.totalorder %s4342_s14, 0 }
  0x69   : > { %s3176_s18 = scalar_lea.hbm %s4348_s13, 256 }
  0x6a   : > { %p3177_p8 = scmp.ne.s32.totalorder %s4348_s13, %s3176_s18  ;;  %p3183_p4 = scmp.lt.u32.totalorder %s3176_s18, %s4348_s13 }
  0x6c   : > { %p3179_p2 = pnand %p3177_p8, %p4349_p10 }
  0x6e   : > { %p3180_p1 = pneg %p3179_p2 }
  0x70   : > { %p3185_p5 = pnand %p3183_p4, %p3180_p1 }
  0x72   : > { %3188 = shalt.err (!%p3185_p5)
}
  0x73   : > { %s3189_s21 = scalar_lea.vmem %s522_s20, 256  ;;  %p3197_p0 = scmp.lt.s32.totalorder %s522_s20, %s522_s20 }
  0x74   : > { %p3190_p6 = scmp.ne.s32.totalorder %s522_s20, %s3189_s21  ;;  %p3198_p3 = scmp.lt.s32.totalorder %s3189_s21, %s3189_s21 }
  0x76   : > { %p3192_p9 = pnand %p3190_p6, %p4349_p10  ;;  %p3199_p7 = por %p3198_p3, %p3197_p0 }
  0x78   : > { %p3193_p12 = pneg %p3192_p9 }
  0x7a   : > { %p3200_p11 = pnand %p3199_p7, %p3193_p12 }
  0x7c   : > { %3203 = shalt.err (!%p3200_p11)
}
  0x7d   : > { %s3467_s8 = smov 128   ;;  %s3468_s7 = smov 8  }
  0x7e   : > { %p4350_p8 = scmp.ne.s32.totalorder %s4338_s22, 0  ;;  %s3729_s26 = sshll.u32 %s3458_s30, 10 }
  0x7f   : > { %s4351_s6 = sld [smem:[#allocation32_spill]]  ;;  %s605_s23 = scalar_lea.vmem [#allocation12], %s3708_s4 }
  0x80   : > { %2921 = dma.hbm_to_vmem [thread:$0]  (!%p4350_p8), %s4348_s13, 256, %s522_s20, [#allocation7], %s3467_s8, %s3467_s8, %s3468_s7  }
  0x81   : > { %s612_s5 = sshll.u32 %s605_s23, 4  ;;  %s3738_s5 = int_to_ptr.vmem [resolvable:$true] %s612_s5 }
  0x85   : > { %s3735_s25 = scalar_lea.hbm %s4351_s6, %s3729_s26  ;;  %s3209_s9 = scalar_lea.hbm %s4351_s6, 2048 }
  0x86   : > { %s3204_s27 = scalar_lea.hbm %s3735_s25, 1024  ;;  %p3210_p4 = scmp.lt.u32.totalorder %s3735_s25, %s4351_s6 }
  0x87   : > { %p3205_p11 = scmp.ne.s32.totalorder %s3735_s25, %s3204_s27  ;;  %p3211_p5 = scmp.lt.u32.totalorder %s3209_s9, %s3204_s27 }
  0x88   : > { %p3213_p9 = scmp.lt.u32.totalorder %s3204_s27, %s3735_s25 }
  0x89   : > { %p3207_p2 = pnand %p3205_p11, %p3682_p13  ;;  %p3212_p6 = por %p3211_p5, %p3210_p4 }
  0x8b   : > { %p3208_p1 = pneg %p3207_p2  ;;  %p3214_p12 = por %p3213_p9, %p3212_p6 }
  0x8d   : > { %p3215_p0 = pnand %p3214_p12, %p3208_p1 }
  0x8f   : > { %3218 = shalt.err (!%p3215_p0)
}
  0x90   : > { %s3219_s7 = scalar_lea.vmem %s3738_s5, 1024  ;;  %s3469_s18 = smov [#allocation12]  }
  0x91   : > { %p3220_p3 = scmp.ne.s32.totalorder %s3738_s5, %s3219_s7  ;;  %s3224_s19 = sshll.u32 %s3469_s18, 4  ;;  %s3225_s19 = int_to_ptr.vmem [resolvable:$false] %s3224_s19 }
  0x92   : > { %s3226_s24 = scalar_lea.vmem %s3225_s19, 2048  ;;  %p3227_p2 = scmp.lt.s32.totalorder %s3738_s5, %s3225_s19 }
  0x93   : > { %p3222_p7 = pnand %p3220_p3, %p3682_p13  ;;  %p3228_p8 = scmp.lt.s32.totalorder %s3226_s24, %s3219_s7 }
  0x95   : > { %p3223_p11 = pneg %p3222_p7  ;;  %p3229_p4 = por %p3228_p8, %p3227_p2 }
  0x97   : > { %p3230_p5 = pnand %p3229_p4, %p3223_p11 }
  0x99   : > { %3233 = shalt.err (!%p3230_p5)
}
  0x9a   : > { %p4352_p1 = scmp.ne.s32.totalorder %s4344_s2, 0  ;;  %s4353_s15 = smov 4  }
  0x9b   : > { %s4354_s23 = smov 64   ;;  %s3470_s27 = smov [#allocation8]  }
  0x9c   : > { %2937 = dma.hbm_to_vmem [thread:$0]  (!%p4352_p1), %s3735_s25, 1024, %s3738_s5, %s3676_s17, %s4354_s23, %s4354_s23, %s4353_s15  }
  0x9d   : > { %s535_s30 = sshll.u32 %s3470_s27, 4  ;;  %s4355_s10 = sld [smem:[#allocation36_spill]]  ;;  %s536_s30 = int_to_ptr.vmem [resolvable:$true] %s535_s30 }
  0x9e   : > { %s4356_s18 = sld [smem:[#allocation28_spill]] }
  0xa3   : > { %s3769_s21 = scalar_lea.hbm %s4355_s10, %s3729_s26 }
  0xa4   : > { %s3234_s19 = scalar_lea.hbm %s4356_s18, 16 }
  0xa5   : > { %p3235_p8 = scmp.ne.s32.totalorder %s4356_s18, %s3234_s19  ;;  %p3241_p12 = scmp.lt.u32.totalorder %s3234_s19, %s4356_s18 }
  0xa7   : > { %p3237_p6 = pnand %p3235_p8, %p4349_p10 }
  0xa9   : > { %p3238_p9 = pneg %p3237_p6 }
  0xab   : > { %p3243_p0 = pnand %p3241_p12, %p3238_p9 }
  0xad   : > { %3246 = shalt.err (!%p3243_p0)
}
  0xae   : > { %s3247_s27 = scalar_lea.vmem %s536_s30, 16  ;;  %s3254_s20 = scalar_lea.vmem %s536_s30, 32 }
  0xaf   : > { %p3248_p3 = scmp.ne.s32.totalorder %s536_s30, %s3247_s27  ;;  %p3255_p2 = scmp.lt.s32.totalorder %s536_s30, %s536_s30 }
  0xb0   : > { %p3256_p4 = scmp.lt.s32.totalorder %s3254_s20, %s3247_s27 }
  0xb1   : > { %p3250_p7 = pnand %p3248_p3, %p4349_p10 }
  0xb2   : > { %p3257_p5 = por %p3256_p4, %p3255_p2 }
  0xb3   : > { %p3251_p11 = pneg %p3250_p7 }
  0xb5   : > { %p3258_p1 = pnand %p3257_p5, %p3251_p11 }
  0xb7   : > { %3261 = shalt.err (!%p3258_p1)
}
  0xb8   : > { %p4357_p8 = scmp.ne.s32.totalorder %s4338_s22, 0  ;;  %s644_s8 = scalar_lea.vmem [#allocation13], %s3708_s4 }
  0xb9   : > { %s651_s7 = sshll.u32 %s644_s8, 4  ;;  %s3471_s19 = smov [#allocation9]   ;;  %s3790_s7 = int_to_ptr.vmem [resolvable:$true] %s651_s7 }
  0xba   : > { %2924 = dma.hbm_to_vmem [thread:$0]  (!%p4357_p8), %s4356_s18, 16, %s536_s30, [#allocation7]  }
  0xbb   : > { %s3792_s24 = sshll.u32 %s3471_s19, 4  ;;  %s3262_s25 = scalar_lea.hbm %s3769_s21, 1024  ;;  %s547_s24 = int_to_ptr.vmem [resolvable:$true] %s3792_s24 }
  0xbc   : > { %p3263_p1 = scmp.ne.s32.totalorder %s3769_s21, %s3262_s25  ;;  %s3267_s20 = scalar_lea.hbm %s4355_s10, 2048 }
  0xbd   : > { %p3268_p12 = scmp.lt.u32.totalorder %s3769_s21, %s4355_s10  ;;  %p3269_p0 = scmp.lt.u32.totalorder %s3267_s20, %s3262_s25 }
  0xbe   : > { %p3265_p6 = pnand %p3263_p1, %p3682_p13  ;;  %p3271_p7 = scmp.lt.u32.totalorder %s3262_s25, %s3769_s21 }
  0xbf   : > { %p3270_p3 = por %p3269_p0, %p3268_p12 }
  0xc0   : > { %p3266_p9 = pneg %p3265_p6 }
  0xc1   : > { %p3272_p11 = por %p3271_p7, %p3270_p3 }
  0xc3   : > { %p3273_p2 = pnand %p3272_p11, %p3266_p9 }
  0xc5   : > { %3276 = shalt.err (!%p3273_p2)
}
  0xc6   : > { %s3277_s30 = scalar_lea.vmem %s3790_s7, 1024  ;;  %s3472_s8 = smov [#allocation13]  }
  0xc7   : > { %p3278_p4 = scmp.ne.s32.totalorder %s3790_s7, %s3277_s30  ;;  %s3282_s19 = sshll.u32 %s3472_s8, 4  ;;  %s3283_s19 = int_to_ptr.vmem [resolvable:$false] %s3282_s19 }
  0xc8   : > { %s3284_s5 = scalar_lea.vmem %s3283_s19, 2048  ;;  %p3285_p6 = scmp.lt.s32.totalorder %s3790_s7, %s3283_s19 }
  0xc9   : > { %p3280_p5 = pnand %p3278_p4, %p3682_p13  ;;  %p3286_p8 = scmp.lt.s32.totalorder %s3284_s5, %s3277_s30 }
  0xcb   : > { %p3281_p1 = pneg %p3280_p5  ;;  %p3287_p12 = por %p3286_p8, %p3285_p6 }
  0xcd   : > { %p3288_p0 = pnand %p3287_p12, %p3281_p1 }
  0xcf   : > { %3291 = shalt.err (!%p3288_p0)
}
  0xd0   : > { %p4358_p9 = scmp.ne.s32.totalorder %s4344_s2, 0  ;;  %s4359_s3 = sld [smem:[#allocation29_spill]] }
  0xd2   : > { %2940 = dma.hbm_to_vmem [thread:$0]  (!%p4358_p9), %s3769_s21, 1024, %s3790_s7, %s3676_s17, %s4354_s23, %s4354_s23, %s4353_s15  }
  0xd6   : > { %s3292_s20 = scalar_lea.hbm %s4359_s3, 16 }
  0xd7   : > { %p3293_p8 = scmp.ne.s32.totalorder %s4359_s3, %s3292_s20  ;;  %p3299_p11 = scmp.lt.u32.totalorder %s3292_s20, %s4359_s3 }
  0xd9   : > { %p3295_p3 = pnand %p3293_p8, %p4349_p10 }
  0xdb   : > { %p3296_p7 = pneg %p3295_p3 }
  0xdd   : > { %p3301_p2 = pnand %p3299_p11, %p3296_p7 }
  0xdf   : > { %3304 = shalt.err (!%p3301_p2)
}
  0xe0   : > { %s3305_s19 = scalar_lea.vmem %s547_s24, 16  ;;  %s3312_s21 = scalar_lea.vmem %s547_s24, 32 }
  0xe1   : > { %p3306_p4 = scmp.ne.s32.totalorder %s547_s24, %s3305_s19  ;;  %p3313_p6 = scmp.lt.s32.totalorder %s547_s24, %s547_s24 }
  0xe2   : > { %p3314_p12 = scmp.lt.s32.totalorder %s3312_s21, %s3305_s19 }
  0xe3   : > { %p3308_p5 = pnand %p3306_p4, %p4349_p10 }
  0xe4   : > { %p3315_p0 = por %p3314_p12, %p3313_p6 }
  0xe5   : > { %p3309_p1 = pneg %p3308_p5 }
  0xe7   : > { %p3316_p9 = pnand %p3315_p0, %p3309_p1 }
  0xe9   : > { %3319 = shalt.err (!%p3316_p9)
}
  0xea   : > { %p4360_p8 = scmp.ne.s32.totalorder %s4338_s22, 0  ;;  %s3473_s25 = smov [#allocation15]  }
  0xeb   : > { %s556_s27 = sshll.u32 %s3473_s25, 4  ;;  %s4361_s12 = sld [smem:[#allocation38_spill]]  ;;  %s557_s27 = int_to_ptr.vmem [resolvable:$true] %s556_s27 }
  0xec   : > { %2927 = dma.hbm_to_vmem [thread:$0]  (!%p4360_p8), %s4359_s3, 16, %s547_s24, [#allocation10]  }
  0xed   : > { %s3320_s19 = scalar_lea.hbm %s4288_s16, 1024 }
  0xee   : > { %p3321_p9 = scmp.ne.s32.totalorder %s4288_s16, %s3320_s19  ;;  %p3327_p11 = scmp.lt.u32.totalorder %s3320_s19, %s4288_s16 }
  0xf0   : > { %p3323_p3 = pnand %p3321_p9, %p4349_p10 }
  0xf1   : > { %s3842_s9 = scalar_lea.hbm %s4361_s12, %s3729_s26 }
  0xf2   : > { %p3324_p7 = pneg %p3323_p3 }
  0xf4   : > { %p3329_p2 = pnand %p3327_p11, %p3324_p7 }
  0xf6   : > { %3332 = shalt.err (!%p3329_p2)
}
  0xf7   : > { %s3333_s5 = scalar_lea.vmem %s557_s27, 1024  ;;  %p3341_p6 = scmp.lt.s32.totalorder %s557_s27, %s557_s27 }
  0xf8   : > { %p3334_p4 = scmp.ne.s32.totalorder %s557_s27, %s3333_s5  ;;  %p3342_p12 = scmp.lt.s32.totalorder %s3333_s5, %s3333_s5 }
  0xfa   : > { %p3336_p5 = pnand %p3334_p4, %p4349_p10  ;;  %p3343_p0 = por %p3342_p12, %p3341_p6 }
  0xfc   : > { %p3337_p1 = pneg %p3336_p5 }
  0xfe   : > { %p3344_p13 = pnand %p3343_p0, %p3337_p1 }
 0x100   : > { %3347 = shalt.err (!%p3344_p13)
}
 0x101   : > { %2930 = dma.hbm_to_vmem [thread:$0]  (!%p4360_p8), %s4288_s16, 1024, %s557_s27, [#allocation7], %s4354_s23, %s4354_s23, %s4353_s15  }
 0x102   : > { %s671_s14 = scalar_lea.vmem [#allocation14], %s3708_s4  ;;  %s3348_s20 = scalar_lea.hbm %s3842_s9, 1024 }
 0x103   : > { %s678_s25 = sshll.u32 %s671_s14, 4  ;;  %p3349_p13 = scmp.ne.s32.totalorder %s3842_s9, %s3348_s20  ;;  %s3866_s25 = int_to_ptr.vmem [resolvable:$true] %s678_s25 }
 0x104   : > { %p4362_p10 = scmp.ne.s32.totalorder %s4346_s11, 0  ;;  %s3353_s30 = scalar_lea.hbm %s4361_s12, 2048 }
 0x105   : > { %p3354_p7 = scmp.lt.u32.totalorder %s3842_s9, %s4361_s12  ;;  %p3355_p11 = scmp.lt.u32.totalorder %s3353_s30, %s3348_s20 }
 0x106   : > { %p3351_p9 = pnand %p3349_p13, %p4362_p10  ;;  %p3357_p8 = scmp.lt.u32.totalorder %s3348_s20, %s3842_s9 }
 0x107   : > { %p3356_p2 = por %p3355_p11, %p3354_p7 }
 0x108   : > { %p3352_p3 = pneg %p3351_p9 }
 0x109   : > { %p3358_p4 = por %p3357_p8, %p3356_p2 }
 0x10b   : > { %p3359_p5 = pnand %p3358_p4, %p3352_p3 }
 0x10d   : > { %3362 = shalt.err (!%p3359_p5)
}
 0x10e   : > { %s3363_s4 = scalar_lea.vmem %s3866_s25, 1024  ;;  %s3474_s27 = smov [#allocation14]  }
 0x10f   : > { %p3364_p1 = scmp.ne.s32.totalorder %s3866_s25, %s3363_s4  ;;  %s3368_s21 = sshll.u32 %s3474_s27, 4  ;;  %s3369_s21 = int_to_ptr.vmem [resolvable:$false] %s3368_s21 }
 0x110   : > { %s3370_s24 = scalar_lea.vmem %s3369_s21, 2048  ;;  %p3371_p0 = scmp.lt.s32.totalorder %s3866_s25, %s3369_s21 }
 0x111   : > { %p3366_p6 = pnand %p3364_p1, %p4362_p10  ;;  %p3372_p13 = scmp.lt.s32.totalorder %s3370_s24, %s3363_s4 }
 0x113   : > { %p3367_p12 = pneg %p3366_p6  ;;  %p3373_p9 = por %p3372_p13, %p3371_p0 }
 0x115   : > { %p3374_p7 = pnand %p3373_p9, %p3367_p12 }
 0x117   : > { %3377 = shalt.err (!%p3374_p7)
}
 0x118   : > { %p4363_p3 = scmp.ne.s32.totalorder %s4344_s2, 0  ;;  %p4364_p10 = scmp.ne.s32.totalorder %s4337_s1, 0 }
 0x119   : > { %p4365_p11 = scmp.eq.s32.totalorder (!%p4364_p10), %s3595_s0, 0 }
 0x11a   : > { %2943 = dma.hbm_to_vmem [thread:$0]  (!%p4363_p3), %s3842_s9, 1024, %s3866_s25, %s3676_s17, %s4354_s23, %s4354_s23, %s4353_s15  }
 0x11b   : > { %708 = sbr.rel (%p4364_p10) target bundleno = 3464 (0xd88), region = 92 }
 0x122   : > { %3421 = dma.done.wait (%p4365_p11), [#allocation4], 128   ;;  %p4366_p2 = pmov %p4365_p11 }
 0x124   : > { %3423 = vsyncadd (%p4366_p2), [#allocation4], 4294967168  ;;  %p4367_p8 = pmov %p4366_p2 }
 0x125   : > { %p4368_p4 = pmov %p4366_p2 }
 0x126   : > { %3425 = dma.done.wait (%p4367_p8), [#allocation7], 272  }
 0x127   : > { %3427 = vsyncadd (%p4368_p4), [#allocation7], 4294967024  ;;  %p4369_p5 = pmov %p4366_p2 }
 0x128   : > { %p4370_p1 = pmov %p4366_p2 }
 0x129   : > { %3429 = dma.done.wait (%p4369_p5), [#allocation10], 16  }
 0x12a   : > { %3431 = vsyncadd (%p4370_p1), [#allocation10], 4294967280  ;;  %s4371_s1 = sld [smem:[#allocation23_spill]]  ;;  %s726_s2 = sand.u32 1, %s3595_s0  }
 0x12b   : > { %s728_s11 = sand.u32 1, %s3450_s28   ;;  %s727_s15 = scalar_lea.sflag [#allocation4], %s726_s2 }
 0x12c   : > { %s2881_s17 = smul.u32 192, %s728_s11 }
 0x12e   : > { %s3909_s23 = scalar_lea.vmem [#allocation11], %s2881_s17 }
 0x130   : > { %p4372_p6 = scmp.ne.s32.totalorder %s4371_s1, 0 }
 0x132   : > { %3433 = dma.done.wait (%p4372_p6), %s727_s15, 6144  }
 0x133   : > { %3435 = vsyncadd (%p4372_p6), %s727_s15, 4294961152  ;;  %s2556_s9 = sshll.u32 %s728_s11, 6  ;;  %p4373_p12 = pmov %p4370_p1 }
 0x134   : > { %s3915_s7 = scalar_lea.vmem [#allocation12], %s2556_s9  ;;  %s3917_s5 = scalar_lea.vmem [#allocation13], %s2556_s9 }
 0x135   : > { %s3919_s10 = scalar_lea.vmem [#allocation14], %s2556_s9 }
 0x136   : > { %3437 = dma.done.wait (%p4373_p12), [#allocation7], 1024   ;;  %p4374_p0 = pmov %p4370_p1 }
 0x137   : > { %p849_p13 = scmp.lt.s32.totalorder %s3595_s0, 1  ;;  %v875_v0 = vlaneseq  ;;  %v3475_v2 = vmov 0.0   ;;  %s4378_s17 = sld [smem:[#allocation31_spill]] }
 0x138   : > { %3439 = vsyncadd (%p4374_p0), [#allocation7], 4294966272  ;;  %s4379_s20 = sld [smem:[#allocation37_spill]]  ;;  %s4380_s19 = sld [smem:[#allocation39_spill]] }
 0x139   : > { %s3927_s26 = scalar_select %p849_p13, %s3595_s0, 1  ;;  %v3930_v1 = vand.u32 127, %v875_v0 }
 0x13a   : > { %s4381_s1 = sld [smem:[#allocation40_spill]]  ;;  %s4382_s12 = sld [smem:[#allocation41_spill]] }
 0x13b   : > { %s2882_s14 = smul.u32 3, %s3927_s26  ;;  %vm877_vm0 = vcmp.lt.s32.totalorder %v3930_v1, 32  ;;  %p4383_p9 = scmp.ne.s32.totalorder %s3595_s0, 0 }
 0x13c   : > { %v3949_v3 = vsel %vm877_vm0, 1.0, %v3475_v2  ;;  %v2647_v4 = vld [vmem:[#allocation3] sm:$0xff] (!%p4383_p9)   ;;  %v2562_v24 = vld [vmem:[#allocation8] ss:$0 sm:$0xff] (!%p4383_p9)  ;;  %v2563_v26 = vld [vmem:[#allocation9] ss:$0 sm:$0xff] (!%p4383_p9) }
 0x13d   : > { %s3954_s15 = scalar_lea.vmem %s4378_s17, %s2882_s14  ;;  %883 = sbr.rel (%p4383_p9) target bundleno = 637 (0x27d), region = 132  ;;  %v2648_v5 = vunpack.c.l.bf16 (!%p4383_p9), %v2647_v4  ;;  %v2649_v6 = vunpack.c.h.bf16 (!%p4383_p9), %v2647_v4 }
 0x13e   : > { %s864_s22 = scalar_lea.vmem %s4379_s20, %s3927_s26  ;;  %s867_s27 = scalar_lea.vmem %s4380_s19, %s3927_s26 }
 0x13f   : > { %890 = vadd.xlane.f32.xlu0 (!%p4383_p9), %v2648_v5 }
 0x140   : > { %s870_s4 = scalar_lea.vmem %s4381_s1, %s3927_s26  ;;  %s873_s13 = scalar_lea.vmem %s4382_s12, %s3927_s26 }
 0x143   : > { %892 = vadd.xlane.f32.xlu0 (!%p4383_p9), %v2649_v6 }
 0x1cc   : > { %v891_v7 = vpop.xlane.xlu0 %890 }
 0x1cd   : > { %v894_v8 = vmul.f32 0.03125, %v891_v7 }
 0x1cf   : > { %v896_v9 = vsub.f32 %v2648_v5, %v894_v8 }
 0x1d0   : > { %v893_v10 = vpop.xlane.xlu0 %892 }
 0x1d1   : > { %v895_v11 = vmul.f32 0.03125, %v893_v10  ;;  %v898_v12 = vmul.f32 %v3949_v3, %v896_v9 }
 0x1d3   : > { %v897_v13 = vsub.f32 %v2649_v6, %v895_v11  ;;  %v900_v14 = vmul.f32 %v898_v12, %v898_v12 }
 0x1d5   : > { %v899_v15 = vmul.f32 %v3949_v3, %v897_v13  ;;  %902 = vadd.xlane.f32.xlu1 %v900_v14 }
 0x1d7   : > { %v901_v16 = vmul.f32 %v899_v15, %v899_v15 }
 0x1d9   : > { %904 = vadd.xlane.f32.xlu1 %v901_v16 }
 0x262   : > { %v903_v17 = vpop.xlane.xlu1 %902 }
 0x263   : > { %v906_v18 = vmul.f32 0.03125, %v903_v17 }
 0x265   : > { %v908_v19 = vadd.f32 1e-12, %v906_v18 }
 0x266   : > { %v905_v20 = vpop.xlane.xlu1 %904 }
 0x267   : > { %3006 = vrsqrt.f32 %v908_v19  ;;  %v907_v21 = vmul.f32 0.03125, %v905_v20 }
 0x269   : > { %v909_v22 = vadd.f32 1e-12, %v907_v21 }
 0x26b   : > { %3008 = vrsqrt.f32 %v909_v22 }
 0x271   : > { %v3007_v23 = vpop.eup %3006 }
 0x272   : > { %v912_v25 = vmul.f32 %v3007_v23, %v898_v12 }
 0x274   : > { %v920_v27 = vmul.f32 %v2562_v24, %v912_v25 }
 0x275   : > { %v3009_v28 = vpop.eup %3008 }
 0x276   : > { %v928_v29 = vadd.f32 %v2563_v26, %v920_v27  ;;  %v913_v30 = vmul.f32 %v3009_v28, %v899_v15 }
 0x278   : > { %930 = vst [vmem:[#allocation2] sm:$0xff] %v928_v29  ;;  %v921_v31 = vmul.f32 %v2562_v24, %v913_v30 }
 0x27a   : > { %v929_v32 = vadd.f32 %v2563_v26, %v921_v31 }
 0x27c   : > { %931 = vst [vmem:[#allocation2 + $0x8] sm:$0xff] %v929_v32 }
 0x27d PF: > { %v3010_v33 = vld [vmem:[%s3909_s23 + $0x4] ss:$12 sps:$4 sm:$0xff]   ;;  %2713 = vmatprep.subr.bf16.mxu1 %v3475_v2  ;;  %v3012_v34 = vld [vmem:[%s3909_s23] ss:$12 sps:$4 sm:$0xff]   ;;  %v3476_v35 = vmov 0   ;;  %vm3477_vm1 = vmmov 0  }
 0x27e   : > { %1146 = vmatprep.mubr.bf16.mxu0 %v3476_v35  ;;  %1114 = vmatprep.subr.bf16.mxu0 %v3010_v33  ;;  %v3013_v36 = vld [vmem:[%s3909_s23 + $0x1c] ss:$12 sps:$4 sm:$0xff]   ;;  %v3015_v37 = vld [vmem:[%s3909_s23 + $0x18] ss:$12 sps:$4 sm:$0xff]   ;;  %v3016_v38 = vld [vmem:[%s3909_s23 + $0x34] ss:$12 sps:$4 sm:$0xff]  }
 0x27f   : > { %1115 = vmatpush1.bf16.msra.mxu0 %v3012_v34  ;;  %v3018_v39 = vld [vmem:[%s3909_s23 + $0x30] ss:$12 sps:$4 sm:$0xff]   ;;  %v3019_v40 = vld [vmem:[%s3909_s23 + $0x4c] ss:$12 sps:$4 sm:$0xff]   ;;  %v3021_v41 = vld [vmem:[%s3909_s23 + $0x48] ss:$12 sps:$4 sm:$0xff]   ;;  %2729 = vmatprep.mubr.msk.bf16.mxu1 %vm3477_vm1, %v3475_v2 }
 0x280   : > { %1116 = vmatprep.subr.bf16.mxu0 %v3013_v36  ;;  %v3022_v42 = vld [vmem:[%s3909_s23 + $0x64] ss:$12 sps:$4 sm:$0xff]   ;;  %v3034_v43 = vld [vmem:[%s3909_s23 + $0x8] ss:$12 sps:$4 sm:$0xff]   ;;  %v3035_v44 = vld [vmem:[%s3909_s23 + $0x20] ss:$12 sps:$4 sm:$0xff]  }
 0x281   : > { %2714 = vmatpush3.bf16.msra.mxu1 %v3034_v43  ;;  %v3024_v45 = vld [vmem:[%s3909_s23 + $0x60] ss:$12 sps:$4 sm:$0xff]   ;;  %v3025_v46 = vld [vmem:[%s3909_s23 + $0x7c] ss:$12 sps:$4 sm:$0xff]   ;;  %v3036_v47 = vld [vmem:[%s3909_s23 + $0x38] ss:$12 sps:$4 sm:$0xff]  }
 0x282   : > { %2715 = vmatprep.subr.bf16.mxu1 %v3475_v2  ;;  %v3027_v48 = vld [vmem:[%s3909_s23 + $0x78] ss:$12 sps:$4 sm:$0xff]   ;;  %v3028_v49 = vld [vmem:[%s3909_s23 + $0x94] ss:$12 sps:$4 sm:$0xff]   ;;  %v3037_v50 = vld [vmem:[%s3909_s23 + $0x50] ss:$12 sps:$4 sm:$0xff]  }
 0x283   : > { %1117 = vmatpush1.bf16.msra.mxu0 %v3015_v37  ;;  %v3030_v51 = vld [vmem:[%s3909_s23 + $0x90] ss:$12 sps:$4 sm:$0xff]   ;;  %v3031_v52 = vld [vmem:[%s3909_s23 + $0xac] ss:$12 sps:$4 sm:$0xff]   ;;  %v3038_v53 = vld [vmem:[%s3909_s23 + $0x68] ss:$12 sps:$4 sm:$0xff]  }
 0x284   : > { %1118 = vmatprep.subr.bf16.mxu0 %v3016_v38  ;;  %v3033_v54 = vld [vmem:[%s3909_s23 + $0xa8] ss:$12 sps:$4 sm:$0xff]   ;;  %v4003_v56 = vld [vmem:[#allocation2 + $0x8] sm:$0xff]  ;;  %v3040_v59 = vld [vmem:[%s3909_s23 + $0x98] ss:$12 sps:$4 sm:$0xff]   ;;  %v4023_v61 = vshrl.u32 %v875_v0, 7 }
 0x285   : > { %2716 = vmatpush3.bf16.msra.mxu1 %v3035_v44  ;;  %v4001_v55 = vld [vmem:[#allocation2] sm:$0xff]  ;;  %v3039_v57 = vld [vmem:[%s3909_s23 + $0x80] ss:$12 sps:$4 sm:$0xff]   ;;  %v3041_v60 = vld [vmem:[%s3909_s23 + $0xb0] ss:$12 sps:$4 sm:$0xff]   ;;  %vm1275_vm2 = vcmp.ge.s32.totalorder %v3930_v1, 8 }
 0x286   : > { %2717 = vmatprep.subr.bf16.mxu1 %v3475_v2  ;;  %v936_v58 = vpack.c.bf16 %v4003_v56, %v4001_v55  ;;  %v973_v62 = vsub.s32 0, %v4023_v61  ;;  %v969_v63 = vld [vmem:[%s3954_s15] sm:$0x7]  ;;  %vm1276_vm3 = vcmp.lt.s32.totalorder %v3930_v1, 16  ;;  %vm1438_vm4 = vcmp.ge.s32.totalorder %v3930_v1, 16  ;;  %s4384_s23 = sld [smem:[#allocation33_spill]] }
 0x287   : > { %1119 = vmatpush1.bf16.msra.mxu0 %v3018_v39  ;;  %vm1439_vm5 = vcmp.lt.s32.totalorder %v3930_v1, 24  ;;  %vm1559_vm6 = vcmp.ge.s32.totalorder %v3930_v1, 24  ;;  %v977_v4 = vsub.s32 1, %v4023_v61  ;;  %vm1277_vm7 = vmand %vm1275_vm2, %vm1276_vm3  ;;  %vm1200_vm9 = vcmp.lt.s32.totalorder %v3930_v1, 8  ;;  %s4386_s1 = sld [smem:[#allocation34_spill]]  ;;  %s4388_s17 = sld [smem:[#allocation35_spill]] }
 0x288   : > { %1120 = vmatprep.subr.bf16.mxu0 %v3019_v40  ;;  %v974_v5 = vrot.slane %v969_v63, %v973_v62  ;;  %vm1440_vm8 = vmand %vm1438_vm4, %vm1439_vm5  ;;  %v2588_v9 = vsel %vm1200_vm9, 1.0, %v3475_v2  ;;  %v2589_v10 = vsel %vm1277_vm7, 1.0, %v3475_v2  ;;  %v981_v35 = vsub.s32 2, %v4023_v61  ;;  %p2627_p7 = scmp.ne.s32.totalorder %s3595_s0, 1 }
 0x289   : > { %2718 = vmatpush3.bf16.msra.mxu1 %v3036_v47  ;;  %vm1560_vm10 = vmand %vm1559_vm6, %vm877_vm0  ;;  %v978_v6 = vrot.slane %v969_v63, %v977_v4  ;;  %v2592_v11 = vsel %vm1440_vm8, 1.0, %v3475_v2  ;;  %vm1251_vm11 = vcmask 130048   ;;  %vm3479_vm12 = vmmov (!%p2627_p7), 0  }
 0x28a   : > { %2719 = vmatprep.subr.bf16.mxu1 %v3475_v2  ;;  %v2594_v12 = vsel %vm1560_vm10, 1.0, %v3475_v2  ;;  %v982_v36 = vrot.slane %v969_v63, %v981_v35 }
 0x28b   : > { %1121 = vmatpush1.bf16.msra.mxu0 %v3021_v41 }
 0x28c   : > { %1122 = vmatprep.subr.bf16.mxu0 %v3022_v42  ;;  %s4385_s14 = scalar_lea.vmem %s4384_s23, %s3927_s26 }
 0x28d   : > { %2720 = vmatpush3.bf16.msra.mxu1 %v3037_v50  ;;  %s4387_s2 = scalar_lea.vmem %s4386_s1, %s3927_s26  ;;  %s4389_s15 = scalar_lea.vmem %s4388_s17, %s3927_s26 }
 0x28e   : > { %2721 = vmatprep.subr.bf16.mxu1 %v3475_v2 }
 0x28f   : > { %1123 = vmatpush1.bf16.msra.mxu0 %v3024_v45 }
 0x290   : > { %1124 = vmatprep.subr.bf16.mxu0 %v3025_v46 }
 0x291   : > { %2722 = vmatpush3.bf16.msra.mxu1 %v3038_v53 }
 0x292   : > { %2723 = vmatprep.subr.bf16.mxu1 %v3475_v2 }
 0x293   : > { %1125 = vmatpush1.bf16.msra.mxu0 %v3027_v48 }
 0x294   : > { %1126 = vmatprep.subr.bf16.mxu0 %v3028_v49 }
 0x295   : > { %2724 = vmatpush3.bf16.msra.mxu1 %v3039_v57 }
 0x296   : > { %2725 = vmatprep.subr.bf16.mxu1 %v3475_v2 }
 0x297   : > { %1127 = vmatpush1.bf16.msra.mxu0 %v3030_v51  ;;  %v934_v51 = vld [vmem:[#allocation6] sm:$0xff] }
 0x298   : > { %1128 = vmatprep.subr.bf16.mxu0 %v3031_v52 }
 0x299   : > { %2726 = vmatpush3.bf16.msra.mxu1 %v3040_v59 }
 0x29a   : > { %2727 = vmatprep.subr.bf16.mxu1 %v3475_v2 }
 0x29b   : > { %1129 = vmatpush1.bf16.msra.mxu0 %v3033_v54  ;;  %v935_v54 = vld [vmem:[#allocation6 + $0x8] sm:$0xff] }
 0x29c   : > { %2733 = vmatprep.subr.bf16.mxu0 %v3475_v2 }
 0x29d   : > { %2728 = vmatpush3.bf16.msra.mxu1 %v3041_v60 }
 0x29e   : > { %1147 = vmatmul.mubr.bf16.vlgmr.msra.gmra.mrb[0].mxu0 %v936_v58  ;;  %2757 = vmatprep.subr.bf16.mxu1 %v3475_v2 }
 0x29f   : > { %2735 = vmatprep.mubr.msk.bf16.mxu0 %vm3477_vm1, %v3475_v2 }
 0x2a0   : > { %2730 = vmatmul.mubr.bf16.vlgmr.msra.gmra.mrb[0].mxu1 %v936_v58 }
 0x2a1   : > { %2759 = vmatprep.mubr.msk.bf16.mxu1 %vm3477_vm1, %v3475_v2 }
 0x371   : > { %v1148_v0 = vpop.f32.mrb[0].mxu0 }
 0x372   : > { %v1149_v7 = vadd.f32 %v1148_v0, %v974_v5  ;;  %v1150_v8 = vpop.f32.mrb[1].mxu0 }
 0x373   : > { %v1152_v13 = vpop.f32.mrb[2].mxu0  ;;  %v1151_v15 = vadd.f32 %v1150_v8, %v978_v6  ;;  %v1191_v31 = vpop.f32.mrb[0].mxu1 }
 0x374   : > { %v1154_v14 = vpop.f32.mrb[3].mxu0  ;;  %v1153_v16 = vadd.f32 %v1152_v13, %v974_v5  ;;  %v1204_v18 = vmul.f32 %v2588_v9, %v1149_v7  ;;  %v1280_v19 = vmul.f32 %v2589_v10, %v1149_v7  ;;  %v1443_v20 = vmul.f32 %v2592_v11, %v1149_v7  ;;  %v2731_v32 = vpop.f32.mrb[1].mxu1 }
 0x375   : > { %v1155_v17 = vadd.f32 %v1154_v14, %v978_v6  ;;  %v1563_v21 = vmul.f32 %v2594_v12, %v1149_v7  ;;  %v1194_v33 = vpop.f32.mrb[2].mxu1  ;;  %v1192_v37 = vadd.f32 %v1191_v31, %v982_v36 }
 0x376   : > { %v1205_v22 = vmul.f32 %v2588_v9, %v1153_v16  ;;  %v1281_v23 = vmul.f32 %v2589_v10, %v1153_v16  ;;  %v1444_v24 = vmul.f32 %v2592_v11, %v1153_v16  ;;  %v1564_v25 = vmul.f32 %v2594_v12, %v1153_v16  ;;  %v2732_v34 = vpop.f32.mrb[3].mxu1 }
 0x377   : > { %v1198_v26 = vpack.c.bf16 %v1155_v17, %v1151_v15  ;;  %v1195_v38 = vadd.f32 %v1194_v33, %v982_v36  ;;  %v1283_v39 = vmul.f32 %v2589_v10, %v1192_v37  ;;  %v4054_v42 = vmul.f32 %v2588_v9, %v1192_v37 }
 0x378   : > { %v1206_v27 = vpack.c.bf16 %v1205_v22, %v1204_v18  ;;  %v1445_v28 = vpack.c.bf16 %v1444_v24, %v1443_v20  ;;  %v1282_v29 = vpack.c.bf16 %v1281_v23, %v1280_v19  ;;  %v1565_v30 = vpack.c.bf16 %v1564_v25, %v1563_v21 }
 0x379   : > { %2734 = vmatpush3.bf16.xpose.msra.mxu0 %v1198_v26  ;;  %2758 = vmatpush3.bf16.xpose.msra.mxu1 %v1198_v26  ;;  %v1284_v40 = vmul.f32 %v2589_v10, %v1195_v38  ;;  %v4056_v43 = vmul.f32 %v2592_v11, %v1192_v37  ;;  %v4058_v44 = vmul.f32 %v2594_v12, %v1192_v37 }
 0x37a   : > { %2739 = vmatprep.subr.bf16.mxu0 %v3475_v2  ;;  %2769 = vmatprep.subr.bf16.mxu1 %v3475_v2  ;;  %v4060_v45 = vmul.f32 %v2588_v9, %v1195_v38  ;;  %v4062_v46 = vmul.f32 %v2592_v11, %v1195_v38  ;;  %v4064_v47 = vmul.f32 %v2594_v12, %v1195_v38 }
 0x37b   : > { %v1285_v41 = vpack.c.bf16 %v1284_v40, %v1283_v39 }
 0x37c   : > { %v1209_v48 = vpack.c.bf16 %v4060_v45, %v4054_v42  ;;  %v1448_v49 = vpack.c.bf16 %v4062_v46, %v4056_v43  ;;  %v1568_v50 = vpack.c.bf16 %v4064_v47, %v4058_v44  ;;  %v3049_v44 = vld [vmem:[%s3915_s7 + $0x38] sm:$0xff]  }
 0x380   : > { %2736 = vmatmul.mubr.bf16.vlgmr.msra.gmra.mrb[4].mxu0 %v1206_v27  ;;  %2760 = vmatmul.mubr.bf16.vlgmr.msra.gmra.mrb[4].mxu1 %v1445_v28 }
 0x381   : > { %2740 = vmatpush3.bf16.xpose.msra.mxu0 %v1198_v26  ;;  %2770 = vmatpush3.bf16.xpose.msra.mxu1 %v1198_v26 }
 0x382   : > { %2741 = vmatprep.mubr.msk.bf16.mxu0 %vm3477_vm1, %v3475_v2  ;;  %2771 = vmatprep.mubr.msk.bf16.mxu1 %vm3477_vm1, %v3475_v2 }
 0x383   : > { %2745 = vmatprep.subr.bf16.mxu0 %v3475_v2  ;;  %2781 = vmatprep.subr.bf16.mxu1 %v3475_v2 }
 0x388   : > { %2742 = vmatmul.mubr.bf16.vlgmr.msra.gmra.mrb[8].mxu0 %v1282_v29  ;;  %2772 = vmatmul.mubr.bf16.vlgmr.msra.gmra.mrb[8].mxu1 %v1565_v30 }
 0x389   : > { %2747 = vmatprep.mubr.msk.bf16.mxu0 %vm3477_vm1, %v3475_v2  ;;  %2797 = vmatprep.mubr.msk.bf16.mxu1 %vm3477_vm1, %v3475_v2 }
 0x38a   : > { %2746 = vmatpush3.bf16.msra.mxu0 %v1285_v41 }
 0x38b   : > { %2751 = vmatprep.subr.bf16.mxu0 %v3475_v2 }
 0x453   : > { %v1244_v52 = vpop.f32.mrb[4].mxu0  ;;  %v1483_v53 = vpop.f32.mrb[4].mxu1 }
 0x454   : > { %v1245_v57 = vadd.f32 %v1244_v52, %v934_v51  ;;  %v2737_v58 = vpop.f32.mrb[5].mxu0  ;;  %v2761_v59 = vpop.f32.mrb[5].mxu1  ;;  %v1484_v21 = vadd.f32 %v1483_v53, %v934_v51 }
 0x455   : > { %v1247_v60 = vpop.f32.mrb[6].mxu0  ;;  %v1486_v62 = vpop.f32.mrb[6].mxu1 }
 0x456   : > { %v1248_v63 = vadd.f32 %v1247_v60, %v935_v54  ;;  %v2738_v4 = vpop.f32.mrb[7].mxu0  ;;  %v2762_v5 = vpop.f32.mrb[7].mxu1  ;;  %v1252_v0 = vsel %vm1251_vm11, %v1245_v57, -inf  ;;  %v1487_v6 = vadd.f32 %v1486_v62, %v935_v54  ;;  %v1490_v25 = vsel %vm1251_vm11, %v1484_v21, -inf }
 0x457   : > { %1253 = vmax.xlane.f32.xlu1 %v1252_v0 }
 0x458   : > { %v1255_v7 = vsel %vm1251_vm11, %v1248_v63, -inf  ;;  %v1493_v19 = vsel %vm1251_vm11, %v1487_v6, -inf }
 0x45b   : > { %v1603_v8 = vpop.f32.mrb[8].mxu1  ;;  %1256 = vmax.xlane.f32.xlu1 %v1255_v7  ;;  %v1320_v9 = vpop.f32.mrb[8].mxu0 }
 0x45c   : > { %v1321_v10 = vadd.f32 %v1320_v9, %v934_v51  ;;  %v2743_v11 = vpop.f32.mrb[9].mxu0  ;;  %v2773_v12 = vpop.f32.mrb[9].mxu1  ;;  %v1604_v24 = vadd.f32 %v1603_v8, %v934_v51 }
 0x45d   : > { %v1323_v13 = vpop.f32.mrb[10].mxu0  ;;  %v1606_v14 = vpop.f32.mrb[10].mxu1 }
 0x45e   : > { %v1324_v15 = vadd.f32 %v1323_v13, %v935_v54  ;;  %v1607_v16 = vadd.f32 %v1606_v14, %v935_v54  ;;  %v2744_v17 = vpop.f32.mrb[11].mxu0  ;;  %v2774_v18 = vpop.f32.mrb[11].mxu1  ;;  %v1327_v20 = vsel %vm1251_vm11, %v1321_v10, -inf  ;;  %v1610_v26 = vsel %vm1251_vm11, %v1604_v24, -inf }
 0x45f   : > { %1494 = vmax.xlane.f32.xlu1 %v1493_v19  ;;  %1328 = vmax.xlane.f32.xlu0 %v1327_v20  ;;  %v3042_v18 = vld [vmem:[%s3915_s7] sm:$0xff]   ;;  %v3043_v19 = vld [vmem:[%s3915_s7 + $0x8] sm:$0xff]   ;;  %v3044_v20 = vld [vmem:[%s3915_s7 + $0x10] sm:$0xff]  }
 0x460   : > { %v1613_v22 = vsel %vm1251_vm11, %v1607_v16, -inf  ;;  %v1330_v23 = vsel %vm1251_vm11, %v1324_v15, -inf  ;;  %2782 = vmatpush3.bf16.msra.mxu1 %v3042_v18 }
 0x461   : > { %2783 = vmatprep.subr.bf16.mxu1 %v3475_v2 }
 0x463   : > { %1614 = vmax.xlane.f32.xlu1 %v1613_v22  ;;  %1331 = vmax.xlane.f32.xlu0 %v1330_v23  ;;  %v3046_v22 = vld [vmem:[%s3915_s7 + $0x20] sm:$0xff]   ;;  %v3047_v23 = vld [vmem:[%s3915_s7 + $0x28] sm:$0xff]  }
 0x464   : > { %2784 = vmatpush3.bf16.msra.mxu1 %v3043_v19 }
 0x465   : > { %2785 = vmatprep.subr.bf16.mxu1 %v3475_v2 }
 0x467   : > { %1491 = vmax.xlane.f32.xlu0 %v1490_v25 }
 0x468   : > { %2786 = vmatpush3.bf16.msra.mxu1 %v3044_v20  ;;  %v3052_v20 = vld [vmem:[%s3917_s5 + $0x10] sm:$0xff]  }
 0x469   : > { %2787 = vmatprep.subr.bf16.mxu1 %v3475_v2 }
 0x46b   : > { %1611 = vmax.xlane.f32.xlu0 %v1610_v26 }
 0x4e4   : > { %v1254_v27 = vpop.xlane.xlu1 %1253 }
 0x4e5   : > { %v1258_v29 = vsub.f32 %v1245_v57, %v1254_v27 }
 0x4e7   : > { %v1260_v34 = vmul.f32 1.442695, %v1258_v29 }
 0x4e8   : > { %v1257_v28 = vpop.xlane.xlu1 %1256 }
 0x4e9   : > { %v1259_v35 = vsub.f32 %v1248_v63, %v1257_v28 }
 0x4eb   : > { %v1262_v39 = vmul.f32 1.442695, %v1259_v35 }
 0x4ec   : > { %v1329_v30 = vpop.xlane.xlu0 %1328  ;;  %v1495_v32 = vpop.xlane.xlu1 %1494 }
 0x4ed   : > { %v1333_v31 = vsub.f32 %v1321_v10, %v1329_v30  ;;  %v1497_v40 = vsub.f32 %v1487_v6, %v1495_v32 }
 0x4ef   : > { %v1335_v33 = vmul.f32 1.442695, %v1333_v31  ;;  %v1500_v54 = vmul.f32 1.442695, %v1497_v40 }
 0x4f0   : > { %v1332_v36 = vpop.xlane.xlu0 %1331  ;;  %v1615_v51 = vpop.xlane.xlu1 %1614 }
 0x4f1   : > { %v1334_v37 = vsub.f32 %v1324_v15, %v1332_v36  ;;  %3066 = vpow2.f32 %v1335_v33  ;;  %v1617_v57 = vsub.f32 %v1607_v16, %v1615_v51 }
 0x4f2   : > { %3068 = vpow2.f32 %v1260_v34 }
 0x4f3   : > { %v1337_v38 = vmul.f32 1.442695, %v1334_v37  ;;  %v1620_v63 = vmul.f32 1.442695, %v1617_v57 }
 0x4f4   : > { %v1492_v41 = vpop.xlane.xlu0 %1491 }
 0x4f5   : > { %v1496_v52 = vsub.f32 %v1484_v21, %v1492_v41  ;;  %3070 = vpow2.f32 %v1337_v38  ;;  %v3045_v21 = vld [vmem:[%s3915_s7 + $0x18] sm:$0xff]  }
 0x4f6   : > { %3072 = vpow2.f32 %v1262_v39  ;;  %2788 = vmatpush3.bf16.msra.mxu1 %v3045_v21  ;;  %v3053_v21 = vld [vmem:[%s3917_s5 + $0x18] sm:$0xff]  }
 0x4f7   : > { %v1498_v53 = vmul.f32 1.442695, %v1496_v52  ;;  %2789 = vmatprep.subr.bf16.mxu1 %v3475_v2 }
 0x4f8   : > { %v1612_v58 = vpop.xlane.xlu0 %1611 }
 0x4f9   : > { %3074 = vpow2.f32 %v1498_v53  ;;  %v1616_v59 = vsub.f32 %v1604_v24, %v1612_v58  ;;  %v3048_v24 = vld [vmem:[%s3915_s7 + $0x30] sm:$0xff]  }
 0x4fa   : > { %3076 = vpow2.f32 %v1500_v54  ;;  %2790 = vmatpush3.bf16.msra.mxu1 %v3046_v22  ;;  %v3054_v22 = vld [vmem:[%s3917_s5 + $0x20] sm:$0xff]  }
 0x4fb   : > { %v1618_v60 = vmul.f32 1.442695, %v1616_v59  ;;  %v3067_v62 = vpop.eup %3066  ;;  %2791 = vmatprep.subr.bf16.mxu1 %v3475_v2 }
 0x4fc   : > { %v1339_v4 = vsel %vm1251_vm11, %v3067_v62, 0.0  ;;  %v4081_v5 = vpop.eup %3068 }
 0x4fd   : > { %3078 = vpow2.f32 %v1618_v60  ;;  %1340 = vadd.xlane.f32.xlu0 %v1339_v4  ;;  %v1264_v6 = vsel %vm1251_vm11, %v4081_v5, 0.0 }
 0x4fe   : > { %3080 = vpow2.f32 %v1620_v63  ;;  %2792 = vmatpush3.bf16.msra.mxu1 %v3047_v23  ;;  %v3055_v23 = vld [vmem:[%s3917_s5 + $0x28] sm:$0xff]  }
 0x4ff   : > { %v3071_v0 = vpop.eup %3070  ;;  %2793 = vmatprep.subr.bf16.mxu1 %v3475_v2 }
 0x500   : > { %v1342_v7 = vsel %vm1251_vm11, %v3071_v0, 0.0  ;;  %v3073_v8 = vpop.eup %3072 }
 0x501   : > { %1265 = vadd.xlane.f32.xlu0 %v1264_v6  ;;  %1343 = vadd.xlane.f32.xlu1 %v1342_v7  ;;  %v1267_v11 = vsel %vm1251_vm11, %v3073_v8, 0.0 }
 0x502   : > { %2794 = vmatpush3.bf16.msra.mxu1 %v3048_v24  ;;  %v3056_v24 = vld [vmem:[%s3917_s5 + $0x30] sm:$0xff]  }
 0x503   : > { %v4086_v9 = vpop.eup %3074  ;;  %2795 = vmatprep.subr.bf16.mxu1 %v3475_v2 }
 0x504   : > { %v1502_v10 = vsel %vm1251_vm11, %v4086_v9, 0.0  ;;  %v4091_v12 = vpop.eup %3076 }
 0x505   : > { %1268 = vadd.xlane.f32.xlu1 %v1267_v11  ;;  %1503 = vadd.xlane.f32.xlu0 %v1502_v10  ;;  %v1505_v15 = vsel %vm1251_vm11, %v4091_v12, 0.0  ;;  %v3050_v10 = vld [vmem:[%s3917_s5] sm:$0xff]   ;;  %v3051_v11 = vld [vmem:[%s3917_s5 + $0x8] sm:$0xff]  }
 0x506   : > { %2796 = vmatpush3.bf16.msra.mxu1 %v3049_v44 }
 0x507   : > { %v4093_v13 = vpop.eup %3078  ;;  %2821 = vmatprep.subr.bf16.mxu1 %v3475_v2 }
 0x508   : > { %v1622_v14 = vsel %vm1251_vm11, %v4093_v13, 0.0  ;;  %v4099_v16 = vpop.eup %3080 }
 0x509   : > { %1506 = vadd.xlane.f32.xlu1 %v1505_v15  ;;  %1623 = vadd.xlane.f32.xlu0 %v1622_v14  ;;  %v1625_v17 = vsel %vm1251_vm11, %v4099_v16, 0.0 }
 0x50d   : > { %1626 = vadd.xlane.f32.xlu1 %v1625_v17 }
 0x58a   : > { %v1341_v25 = vpop.xlane.xlu0 %1340 }
 0x58b   : > { %3082 = vrcp.f32 %v1341_v25  ;;  %v3057_v25 = vld [vmem:[%s3917_s5 + $0x38] sm:$0xff]  }
 0x58e   : > { %v1344_v26 = vpop.xlane.xlu1 %1343  ;;  %v1266_v28 = vpop.xlane.xlu0 %1265 }
 0x58f   : > { %3084 = vrcp.f32 %v1344_v26 }
 0x592   : > { %v1269_v27 = vpop.xlane.xlu1 %1268  ;;  %v1504_v36 = vpop.xlane.xlu0 %1503 }
 0x593   : > { %3086 = vrcp.f32 %v1269_v27 }
 0x594   : > { %3088 = vrcp.f32 %v1266_v28 }
 0x595   : > { %v3083_v29 = vpop.eup %3082 }
 0x596   : > { %v1347_v31 = vmul.f32 %v3083_v29, %v3067_v62  ;;  %v1507_v34 = vpop.xlane.xlu1 %1506  ;;  %v2596_v62 = vld [vmem:[%s4385_s14] ss:$0 sm:$0xff] }
 0x597   : > { %3090 = vrcp.f32 %v1507_v34 }
 0x598   : > { %3092 = vrcp.f32 %v1504_v36 }
 0x599   : > { %v3085_v30 = vpop.eup %3084 }
 0x59a   : > { %v1348_v32 = vmul.f32 %v3085_v30, %v3071_v0  ;;  %v1627_v42 = vpop.xlane.xlu1 %1626 }
 0x59b   : > { %3094 = vrcp.f32 %v1627_v42 }
 0x59c   : > { %v1349_v33 = vpack.c.bf16 %v1348_v32, %v1347_v31 }
 0x59d   : > { %v3087_v35 = vpop.eup %3086 }
 0x59e   : > { %2748 = vmatmul.mubr.msk.bf16.vlgmr.msra.gmra.mrb[12].mxu0 %vm1251_vm11, %v1349_v33  ;;  %v3089_v37 = vpop.eup %3088  ;;  %v1273_v38 = vmul.f32 %v3087_v35, %v3073_v8  ;;  %v2605_v33 = vld [vmem:[%s4387_s2] ss:$0 sm:$0xff] }
 0x59f   : > { %2752 = vmatpush3.bf16.msra.mxu0 %v1209_v48  ;;  %2753 = vmatprep.mubr.msk.bf16.mxu0 %vm3477_vm1, %v3475_v2  ;;  %v1272_v39 = vmul.f32 %v3089_v37, %v4081_v5  ;;  %v1624_v48 = vpop.xlane.xlu0 %1623 }
 0x5a0   : > { %2763 = vmatprep.subr.bf16.mxu0 %v3475_v2  ;;  %3096 = vrcp.f32 %v1624_v48  ;;  %v3058_v48 = vld [vmem:[%s3919_s10] sm:$0xff]  }
 0x5a1   : > { %v1274_v40 = vpack.c.bf16 %v1273_v38, %v1272_v39  ;;  %v3091_v45 = vpop.eup %3090  ;;  %v2606_v38 = vld [vmem:[%s4389_s15] ss:$0 sm:$0xff] }
 0x5a2   : > { %v3093_v41 = vpop.eup %3092  ;;  %v1511_v51 = vmul.f32 %v3091_v45, %v4091_v12 }
 0x5a3   : > { %v1510_v52 = vmul.f32 %v3093_v41, %v4086_v9  ;;  %v3059_v41 = vld [vmem:[%s3919_s10 + $0x8] sm:$0xff]  }
 0x5a5   : > { %v1512_v53 = vpack.c.bf16 %v1511_v51, %v1510_v52  ;;  %v3095_v43 = vpop.eup %3094  ;;  %v3060_v51 = vld [vmem:[%s3919_s10 + $0x10] sm:$0xff]   ;;  %v3061_v52 = vld [vmem:[%s3919_s10 + $0x18] sm:$0xff]  }
 0x5aa   : > { %2754 = vmatmul.mubr.msk.bf16.vlgmr.msra.gmra.mrb[12].mxu0 %vm1251_vm11, %v1274_v40  ;;  %v3097_v46 = vpop.eup %3096 }
 0x5ab   : > { %2764 = vmatpush3.bf16.msra.mxu0 %v1448_v49  ;;  %2765 = vmatprep.mubr.msk.bf16.mxu0 %vm3477_vm1, %v3475_v2  ;;  %v1631_v49 = vmul.f32 %v3095_v43, %v4099_v16  ;;  %v1630_v54 = vmul.f32 %v3097_v46, %v4093_v13  ;;  %v3063_v43 = vld [vmem:[%s3919_s10 + $0x28] sm:$0xff]   ;;  %v3064_v46 = vld [vmem:[%s3919_s10 + $0x30] sm:$0xff]  }
 0x5ac   : > { %2775 = vmatprep.subr.bf16.mxu0 %v3475_v2 }
 0x5ad   : > { %v1632_v57 = vpack.c.bf16 %v1631_v49, %v1630_v54  ;;  %v3065_v49 = vld [vmem:[%s3919_s10 + $0x38] sm:$0xff]   ;;  %v2607_v54 = vld [vmem:[%s864_s22] ss:$0 sm:$0xff] }
 0x5b6   : > { %2766 = vmatmul.mubr.msk.bf16.vlgmr.msra.gmra.mrb[12].mxu0 %vm1251_vm11, %v1512_v53  ;;  %v3062_v53 = vld [vmem:[%s3919_s10 + $0x20] sm:$0xff]  }
 0x5b7   : > { %2776 = vmatpush3.bf16.msra.mxu0 %v1568_v50  ;;  %2777 = vmatprep.mubr.msk.bf16.mxu0 %vm3477_vm1, %v3475_v2 }
 0x5b8   : > { %2801 = vmatprep.subr.bf16.mxu0 %v3475_v2 }
 0x5c2   : > { %2778 = vmatmul.mubr.msk.bf16.vlgmr.msra.gmra.mrb[12].mxu0 %vm1251_vm11, %v1632_v57 }
 0x5c3   : > { %2817 = vmatprep.mubr.msk.bf16.mxu0 %vm3477_vm1, %v3475_v2  ;;  %2802 = vmatpush3.bf16.msra.mxu0 %v3050_v10 }
 0x5c4   : > { %2803 = vmatprep.subr.bf16.mxu0 %v3475_v2 }
 0x5c7   : > { %2804 = vmatpush3.bf16.msra.mxu0 %v3051_v11 }
 0x5c8   : > { %2805 = vmatprep.subr.bf16.mxu0 %v3475_v2 }
 0x5cb   : > { %2806 = vmatpush3.bf16.msra.mxu0 %v3052_v20 }
 0x5cc   : > { %2807 = vmatprep.subr.bf16.mxu0 %v3475_v2 }
 0x5cf   : > { %2808 = vmatpush3.bf16.msra.mxu0 %v3053_v21 }
 0x5d0   : > { %2809 = vmatprep.subr.bf16.mxu0 %v3475_v2 }
 0x5d3   : > { %2810 = vmatpush3.bf16.msra.mxu0 %v3054_v22 }
 0x5d4   : > { %2811 = vmatprep.subr.bf16.mxu0 %v3475_v2 }
 0x5d7   : > { %2812 = vmatpush3.bf16.msra.mxu0 %v3055_v23 }
 0x5d8   : > { %2813 = vmatprep.subr.bf16.mxu0 %v3475_v2 }
 0x5db   : > { %2814 = vmatpush3.bf16.msra.mxu0 %v3056_v24 }
 0x5dc   : > { %2815 = vmatprep.subr.bf16.mxu0 %v3475_v2 }
 0x5df   : > { %2816 = vmatpush3.bf16.msra.mxu0 %v3057_v25 }
 0x695   : > { %v1670_v47 = vpop.f32.mrb[12].mxu0 }
 0x696   : > { %v2779_v50 = vpop.f32.mrb[13].mxu0 }
 0x697   : > { %v1673_v58 = vpop.f32.mrb[14].mxu0 }
 0x698   : > { %v1679_v59 = vpack.c.bf16 %v1673_v58, %v1670_v47  ;;  %v2780_v60 = vpop.f32.mrb[15].mxu0 }
 0x69a   : > { %2798 = vmatmul.mubr.bf16.vlgmr.msra.gmra.mrb[12].mxu1 %v1679_v59 }
 0x69b   : > { %2837 = vmatprep.mubr.msk.bf16.mxu1 %vm3477_vm1, %v3475_v2  ;;  %2822 = vmatpush3.bf16.msra.mxu1 %v3058_v48 }
 0x69c   : > { %2823 = vmatprep.subr.bf16.mxu1 %v3475_v2 }
 0x69f   : > { %2824 = vmatpush3.bf16.msra.mxu1 %v3059_v41  ;;  %v2626_v41 = vld [vmem:[%s873_s13] ss:$0 sm:$0xff] }
 0x6a0   : > { %2825 = vmatprep.subr.bf16.mxu1 %v3475_v2 }
 0x6a3   : > { %2826 = vmatpush3.bf16.msra.mxu1 %v3060_v51 }
 0x6a4   : > { %2827 = vmatprep.subr.bf16.mxu1 %v3475_v2 }
 0x6a7   : > { %2828 = vmatpush3.bf16.msra.mxu1 %v3061_v52 }
 0x6a8   : > { %2829 = vmatprep.subr.bf16.mxu1 %v3475_v2 }
 0x6ab   : > { %2830 = vmatpush3.bf16.msra.mxu1 %v3062_v53 }
 0x6ac   : > { %2831 = vmatprep.subr.bf16.mxu1 %v3475_v2 }
 0x6af   : > { %2832 = vmatpush3.bf16.msra.mxu1 %v3063_v43 }
 0x6b0   : > { %2833 = vmatprep.subr.bf16.mxu1 %v3475_v2 }
 0x6b3   : > { %2834 = vmatpush3.bf16.msra.mxu1 %v3064_v46 }
 0x6b4   : > { %2835 = vmatprep.subr.bf16.mxu1 %v3475_v2 }
 0x6b7   : > { %2836 = vmatpush3.bf16.msra.mxu1 %v3065_v49 }
 0x76d   : > { %v1785_v63 = vpop.f32.mrb[12].mxu1 }
 0x76e   : > { %v1786_v4 = vadd.f32 %v2596_v62, %v1785_v63  ;;  %v2799_v5 = vpop.f32.mrb[13].mxu1 }
 0x76f   : > { %v1788_v0 = vpop.f32.mrb[14].mxu1 }
 0x770   : > { %v1789_v6 = vadd.f32 %v2596_v62, %v1788_v0  ;;  %v2800_v7 = vpop.f32.mrb[15].mxu1  ;;  %v1792_v8 = vadd.f32 %v1786_v4, %v4001_v55 }
 0x772   : > { %1796 = vadd.xlane.f32.xlu0 %v1792_v8  ;;  %v1793_v9 = vadd.f32 %v1789_v6, %v4003_v56 }
 0x774   : > { %1798 = vadd.xlane.f32.xlu1 %v1793_v9 }
 0x7ff   : > { %v1797_v12 = vpop.xlane.xlu0 %1796 }
 0x800   : > { %v1800_v13 = vmul.f32 0.03125, %v1797_v12 }
 0x801   : > { %v1799_v14 = vpop.xlane.xlu1 %1798 }
 0x802   : > { %v1802_v15 = vsub.f32 %v1792_v8, %v1800_v13  ;;  %v1801_v55 = vmul.f32 0.03125, %v1799_v14 }
 0x804   : > { %v1804_v16 = vmul.f32 %v3949_v3, %v1802_v15  ;;  %v1803_v56 = vsub.f32 %v1793_v9, %v1801_v55 }
 0x806   : > { %v1805_v17 = vmul.f32 %v3949_v3, %v1803_v56  ;;  %v1806_v18 = vmul.f32 %v1804_v16, %v1804_v16  ;;  %v2616_v56 = vld [vmem:[%s867_s27] ss:$0 sm:$0xff] }
 0x808   : > { %1808 = vadd.xlane.f32.xlu0 %v1806_v18  ;;  %v1807_v19 = vmul.f32 %v1805_v17, %v1805_v17 }
 0x80a   : > { %1810 = vadd.xlane.f32.xlu1 %v1807_v19 }
 0x895   : > { %v1809_v26 = vpop.xlane.xlu0 %1808 }
 0x896   : > { %v1812_v27 = vmul.f32 0.03125, %v1809_v26 }
 0x897   : > { %v1811_v28 = vpop.xlane.xlu1 %1810 }
 0x898   : > { %v1814_v29 = vadd.f32 1e-12, %v1812_v27  ;;  %v1813_v30 = vmul.f32 0.03125, %v1811_v28 }
 0x89a   : > { %3098 = vrsqrt.f32 %v1814_v29  ;;  %v1815_v31 = vadd.f32 1e-12, %v1813_v30 }
 0x89c   : > { %3100 = vrsqrt.f32 %v1815_v31 }
 0x8a4   : > { %v3099_v32 = vpop.eup %3098 }
 0x8a5   : > { %v1818_v34 = vmul.f32 %v3099_v32, %v1804_v16 }
 0x8a6   : > { %v3101_v35 = vpop.eup %3100 }
 0x8a7   : > { %v1819_v36 = vmul.f32 %v3101_v35, %v1805_v17  ;;  %v1826_v37 = vmul.f32 %v2605_v33, %v1818_v34 }
 0x8a9   : > { %v1827_v39 = vmul.f32 %v2605_v33, %v1819_v36  ;;  %v4184_v40 = vadd.f32 %v2606_v38, %v1826_v37 }
 0x8ab   : > { %v4186_v42 = vadd.f32 %v2606_v38, %v1827_v39 }
 0x8ad   : > { %v1836_v45 = vpack.c.bf16 %v4186_v42, %v4184_v40 }
 0x8af   : > { %2818 = vmatmul.mubr.bf16.vlgmr.msra.gmra.mrb[16].mxu0 %v1836_v45  ;;  %v2625_v45 = vld [vmem:[%s870_s4] ss:$0 sm:$0xff]  ;;  %s4394_s4 = sld [smem:[#allocation42_spill]] (!%p2627_p7) }
 0x982   : > { %v1942_v57 = vpop.f32.mrb[16].mxu0 }
 0x983   : > { %v1943_v44 = vadd.f32 %v2607_v54, %v1942_v57  ;;  %v2819_v47 = vpop.f32.mrb[17].mxu0  ;;  %v3110_v57 = vld [vmem:[#allocation15] sm:$0xff] (!%p2627_p7)  }
 0x984   : > { %v1945_v50 = vpop.f32.mrb[18].mxu0 }
 0x985   : > { %v1949_v58 = vmul.f32 %v1943_v44, %v1943_v44  ;;  %v1946_v59 = vadd.f32 %v2607_v54, %v1945_v50  ;;  %v2820_v60 = vpop.f32.mrb[19].mxu0  ;;  %v2132_v54 = vmul.u32 (!%p2627_p7), 8, %v4023_v61  ;;  %v3111_v50 = vld [vmem:[#allocation15 + $0x8] sm:$0xff] (!%p2627_p7)   ;;  %v3113_v61 = vld [vmem:[#allocation15 + $0x18] sm:$0xff] (!%p2627_p7)  }
 0x986   : > { %v3114_v60 = vld [vmem:[#allocation15 + $0x20] sm:$0xff] (!%p2627_p7)  }
 0x987   : > { %v1951_v62 = vmul.f32 %v1949_v58, %v1943_v44  ;;  %v1950_v63 = vmul.f32 %v1946_v59, %v1946_v59  ;;  %vm2133_vm13 = vcmp.eq.s32.totalorder (!%p2627_p7), %v3930_v1, %v2132_v54  ;;  %v3115_v1 = vld [vmem:[#allocation15 + $0x28] sm:$0xff] (!%p2627_p7)  }
 0x989   : > { %v1953_v4 = vmul.f32 0.044715, %v1951_v62  ;;  %v1952_v5 = vmul.f32 %v1950_v63, %v1946_v59  ;;  %v3116_v62 = vld [vmem:[#allocation15 + $0x30] sm:$0xff] (!%p2627_p7)   ;;  %v3117_v63 = vld [vmem:[#allocation15 + $0x38] sm:$0xff] (!%p2627_p7)  }
 0x98b   : > { %v1955_v0 = vadd.f32 %v1953_v4, %v1943_v44  ;;  %v1954_v2 = vmul.f32 0.044715, %v1952_v5 }
 0x98d   : > { %v1957_v6 = vmul.f32 0.7978846, %v1955_v0  ;;  %v1956_v7 = vadd.f32 %v1954_v2, %v1946_v59 }
 0x98f   : > { %3102 = vtanh.f32 %v1957_v6  ;;  %v1958_v8 = vmul.f32 0.7978846, %v1956_v7  ;;  %v2630_v7 = vld [vmem:[%s4394_s4] ss:$0 sm:$0xff] (!%p2627_p7) }
 0x991   : > { %3104 = vtanh.f32 %v1958_v8 }
 0x999   : > { %v3103_v9 = vpop.eup %3102 }
 0x99a   : > { %v1961_v10 = vadd.f32 1.0, %v3103_v9 }
 0x99b   : > { %v3105_v11 = vpop.eup %3104 }
 0x99c   : > { %v1963_v12 = vmul.f32 0.5, %v1961_v10  ;;  %v1962_v13 = vadd.f32 1.0, %v3105_v11 }
 0x99e   : > { %v1964_v14 = vmul.f32 0.5, %v1962_v13  ;;  %v1965_v15 = vmul.f32 %v1963_v12, %v1943_v44  ;;  %v3478_v44 = vmov (!%p2627_p7), 0.0  }
 0x99f   : > { %2841 = vmatprep.subr.bf16.mxu0 (!%p2627_p7), %v3478_v44  ;;  %2843 = vmatprep.mubr.msk.bf16.mxu0 (!%p2627_p7), %vm3479_vm12, %v3478_v44  ;;  %v2628_v47 = vsel (!%p2627_p7), %vm2133_vm13, 1.0, %v3478_v44 }
 0x9a0   : > { %v1966_v55 = vmul.f32 %v1964_v14, %v1946_v59  ;;  %2847 = vmatprep.subr.bf16.mxu1 (!%p2627_p7), %v3478_v44  ;;  %v2136_v58 = vpack.c.bf16 (!%p2627_p7), %v2628_v47, %v2628_v47  ;;  %v3112_v59 = vld [vmem:[#allocation15 + $0x10] sm:$0xff] (!%p2627_p7)  }
 0x9a2   : > { %v1967_v16 = vpack.c.bf16 %v1966_v55, %v1965_v15 }
 0x9a4   : > { %2838 = vmatmul.mubr.bf16.vlgmr.msra.gmra.mrb[16].mxu1 %v1967_v16 }
 0x9a5   : > { %2848 = vmatpush3.bf16.msra.mxu1 (!%p2627_p7), %v3110_v57  ;;  %2863 = vmatprep.mubr.msk.bf16.mxu1 (!%p2627_p7), %vm3479_vm12, %v3478_v44 }
 0x9a6   : > { %2849 = vmatprep.subr.bf16.mxu1 (!%p2627_p7), %v3478_v44 }
 0x9a9   : > { %2850 = vmatpush3.bf16.msra.mxu1 (!%p2627_p7), %v3111_v50 }
 0x9aa   : > { %2851 = vmatprep.subr.bf16.mxu1 (!%p2627_p7), %v3478_v44 }
 0x9ad   : > { %2852 = vmatpush3.bf16.msra.mxu1 (!%p2627_p7), %v3112_v59 }
 0x9ae   : > { %2853 = vmatprep.subr.bf16.mxu1 (!%p2627_p7), %v3478_v44 }
 0x9b1   : > { %2854 = vmatpush3.bf16.msra.mxu1 (!%p2627_p7), %v3113_v61 }
 0x9b2   : > { %2855 = vmatprep.subr.bf16.mxu1 (!%p2627_p7), %v3478_v44 }
 0x9b5   : > { %2856 = vmatpush3.bf16.msra.mxu1 (!%p2627_p7), %v3114_v60 }
 0x9b6   : > { %2857 = vmatprep.subr.bf16.mxu1 (!%p2627_p7), %v3478_v44 }
 0x9b9   : > { %2858 = vmatpush3.bf16.msra.mxu1 (!%p2627_p7), %v3115_v1 }
 0x9ba   : > { %2859 = vmatprep.subr.bf16.mxu1 (!%p2627_p7), %v3478_v44 }
 0x9bd   : > { %2860 = vmatpush3.bf16.msra.mxu1 (!%p2627_p7), %v3116_v62 }
 0x9be   : > { %2861 = vmatprep.subr.bf16.mxu1 (!%p2627_p7), %v3478_v44 }
 0x9c1   : > { %2862 = vmatpush3.bf16.msra.mxu1 (!%p2627_p7), %v3117_v63 }
 0xa77   : > { %v2073_v17 = vpop.f32.mrb[16].mxu1 }
 0xa78   : > { %v2074_v18 = vadd.f32 %v2616_v56, %v2073_v17  ;;  %v2839_v19 = vpop.f32.mrb[17].mxu1 }
 0xa79   : > { %v2076_v20 = vpop.f32.mrb[18].mxu1 }
 0xa7a   : > { %v2077_v21 = vadd.f32 %v2616_v56, %v2076_v20  ;;  %v2840_v22 = vpop.f32.mrb[19].mxu1  ;;  %v2080_v23 = vadd.f32 %v2074_v18, %v4184_v40 }
 0xa7c   : > { %2084 = vadd.xlane.f32.xlu0 %v2080_v23  ;;  %v2081_v24 = vadd.f32 %v2077_v21, %v4186_v42 }
 0xa7e   : > { %2086 = vadd.xlane.f32.xlu1 %v2081_v24 }
 0xb09   : > { %v2085_v25 = vpop.xlane.xlu0 %2084 }
 0xb0a   : > { %v2088_v26 = vmul.f32 0.03125, %v2085_v25 }
 0xb0b   : > { %v2087_v27 = vpop.xlane.xlu1 %2086 }
 0xb0c   : > { %v2090_v28 = vsub.f32 %v2080_v23, %v2088_v26  ;;  %v2089_v29 = vmul.f32 0.03125, %v2087_v27 }
 0xb0e   : > { %v2092_v30 = vmul.f32 %v3949_v3, %v2090_v28  ;;  %v2091_v31 = vsub.f32 %v2081_v24, %v2089_v29 }
 0xb10   : > { %v2093_v32 = vmul.f32 %v3949_v3, %v2091_v31  ;;  %v2094_v33 = vmul.f32 %v2092_v30, %v2092_v30 }
 0xb12   : > { %2096 = vadd.xlane.f32.xlu0 %v2094_v33  ;;  %v2095_v34 = vmul.f32 %v2093_v32, %v2093_v32 }
 0xb14   : > { %2098 = vadd.xlane.f32.xlu1 %v2095_v34 }
 0xb9f   : > { %v2097_v35 = vpop.xlane.xlu0 %2096 }
 0xba0   : > { %v2100_v36 = vmul.f32 0.03125, %v2097_v35 }
 0xba1   : > { %v2099_v37 = vpop.xlane.xlu1 %2098 }
 0xba2   : > { %v2102_v38 = vadd.f32 1e-12, %v2100_v36  ;;  %v2101_v39 = vmul.f32 0.03125, %v2099_v37 }
 0xba4   : > { %3106 = vrsqrt.f32 %v2102_v38  ;;  %v2103_v40 = vadd.f32 1e-12, %v2101_v39 }
 0xba6   : > { %3108 = vrsqrt.f32 %v2103_v40 }
 0xbae   : > { %v3107_v42 = vpop.eup %3106 }
 0xbaf   : > { %v2106_v3 = vmul.f32 %v3107_v42, %v2092_v30 }
 0xbb0   : > { %v3109_v48 = vpop.eup %3108 }
 0xbb1   : > { %v2114_v51 = vmul.f32 %v2625_v45, %v2106_v3  ;;  %v2107_v52 = vmul.f32 %v3109_v48, %v2093_v32  ;;  %2129 = sbr.rel (%p2627_p7) target bundleno = 3433 (0xd69), region = 136 }
 0xbb3   : > { %v2122_v53 = vadd.f32 %v2626_v41, %v2114_v51  ;;  %v2115_v43 = vmul.f32 %v2625_v45, %v2107_v52 }
 0xbb5   : > { %2124 = vst [vmem:[#allocation2] sm:$0xff] %v2122_v53  ;;  %v2123_v46 = vadd.f32 %v2626_v41, %v2115_v43 }
 0xbb7   : > { %2125 = vst [vmem:[#allocation2 + $0x8] sm:$0xff] %v2123_v46  ;;  %v2137_v49 = vpack.c.bf16 (!%p2627_p7), %v2123_v46, %v2122_v53 }
 0xbb9   : > { %2842 = vmatpush3.bf16.msra.mxu0 %v2137_v49 }
 0xbbc   : > { %2844 = vmatmul.mubr.msk.bf16.vlgmr.msra.gmra.mrb[0].mxu0 %vm1251_vm11, %v2136_v58 }
 0xc8f   : > { %v2175_v4 = vpop.f32.mrb[0].mxu0 }
 0xc90   : > { %v2181_v5 = vpack.c.bf16 %v2175_v4, %v2175_v4  ;;  %v2845_v0 = vpop.f32.mrb[1].mxu0 }
 0xc91   : > { %v2178_v2 = vpop.f32.mrb[2].mxu0 }
 0xc92   : > { %v2846_v6 = vpop.f32.mrb[3].mxu0  ;;  %2864 = vmatmul.mubr.bf16.vlgmr.msra.gmra.mrb[0].mxu1 %v2181_v5 }
 0xd65   : > { %v2287_v8 = vpop.f32.mrb[0].mxu1 }
 0xd66   : > { %v2288_v9 = vadd.f32 %v2630_v7, %v2287_v8  ;;  %v2865_v10 = vpop.f32.mrb[1].mxu1 }
 0xd67   : > { %v2290_v11 = vpop.f32.mrb[2].mxu1 }
 0xd68   : > { %2293 = vst [vmem:[#allocation16] sm:$0x3] %v2288_v9  ;;  %v2866_v12 = vpop.f32.mrb[3].mxu1 }
 0xd69 PF: > { %p2955_p3 = scmp.eq.s32.totalorder %s3595_s0, 1  ;;  %s3480_s12 = smov [#allocation16]  }
 0xd6a   : > { %s2301_s23 = sshll.u32 %s3480_s12, 4  ;;  %s2302_s23 = int_to_ptr.vmem [resolvable:$true] %s2301_s23 }
 0xd6b   : > { %s3378_s14 = scalar_lea.vmem %s2302_s23, 32  ;;  %p3385_p8 = scmp.lt.s32.totalorder %s2302_s23, %s2302_s23 }
 0xd6c   : > { %p3379_p10 = scmp.ne.s32.totalorder %s2302_s23, %s3378_s14  ;;  %p3386_p4 = scmp.lt.s32.totalorder %s3378_s14, %s3378_s14 }
 0xd6e   : > { %p3380_p11 = pnand %p3379_p10, %p2955_p3  ;;  %p3387_p5 = por %p3386_p4, %p3385_p8 }
 0xd70   : > { %p3381_p2 = pneg %p3380_p11 }
 0xd72   : > { %p3388_p1 = pnand %p3387_p5, %p3381_p2 }
 0xd74   : > { %3391 = shalt.err (!%p3388_p1)
}
 0xd75   : > { %s4395_s1 = sld [smem:[#allocation43_spill]] }
 0xd7b   : > { %s3392_s2 = scalar_lea.hbm %s4395_s1, 32 }
 0xd7c   : > { %p3393_p6 = scmp.ne.s32.totalorder %s4395_s1, %s3392_s2  ;;  %p3398_p13 = scmp.lt.u32.totalorder %s3392_s2, %s4395_s1 }
 0xd7e   : > { %p3394_p12 = pnand %p3393_p6, %p2955_p3 }
 0xd80   : > { %p3395_p0 = pneg %p3394_p12 }
 0xd82   : > { %p3400_p9 = pnand %p3398_p13, %p3395_p0 }
 0xd84   : > { %3403 = shalt.err (!%p3400_p9)
}
 0xd85   : > { %2912 = dma.vmem_to_hbm [thread:$0]  (%p2955_p3), %s2302_s23, 32, %s4395_s1, [#allocation5]  }
 0xd86   : > { %3441 = dma.done.wait (%p2955_p3), [#allocation5], 32  }
 0xd87   : > { %3443 = vsyncadd (%p2955_p3), [#allocation5], 4294967264 }
 0xd88 PF: > { %s4396_s30 = sld [smem:[#allocation24_spill]]  ;;  %s4397_s20 = sld [smem:[#allocation25_spill]] }
 0xd89   : > { %s4398_s27 = smov %s3450_s28  ;;  %s4399_s28 = smov %s3454_s29 }
 0xd8e   : > { %p29_p7 = scmp.ge.s32.totalorder %s4396_s30, 4   ;;  %s4400_s29 = smov %s4397_s20 }
 0xd90   :  { %31 = sbr.rel (!%p29_p7) target bundleno = 24 (0x18), region = 213 }
 0xd97   :  { %2314 = vsyncpa [#allocation4], 1 }
 0xd98   :  { %2316 = vsyncpa [#allocation4 + $0x1], 1 }
 0xd99   :  { %2317 = vsyncpa [#allocation7], 1 }
 0xd9a   :  { %2318 = vsyncpa [#allocation10], 1 }
 0xd9b   :  { %2319 = vsyncpa [#allocation5], 1 }
 0xd9c   :  { %2321 = vsyncpa [#allocation5 + $0x1], 1 }

</bundles_post_ra>
